<compile_context>
chip_gen: v6e
topology: v6e:2x2x1
jax: 0.10.0
libtpu: 0.0.40
codegen_flags: <defaults>
</compile_context>

<pallas_src>
import functools
import math

import jax
import jax.numpy as jnp
import numpy as np
from jax import lax
from jax.experimental import pallas as pl
from jax.experimental.pallas import tpu as pltpu


def _graph_attn_kernel(occ_ref, q_ref, kv_ref, mask_ref, out_ref,
                       wv_acc, z_acc, *, num_heads, head_dim):
    """One grid step == one (dst-tile qi, src-tile kk) pair; all heads together.

    occ_ref  : [nq*nk] int32 in SMEM, 1 iff the (qi,kk) mask tile has any edge
    q_ref    : [tq, H*D]           bf16, Q already scaled by 1/sqrt(D)
    kv_ref   : [tk, H*D + H*(D+1)] bf16, [K_h | V_h with a ones column] per head
    mask_ref : [tq, tk]            int8, mask[dst, src]
    """
    H, D = num_heads, head_dim
    HD = H * D
    qi = pl.program_id(0)
    kk = pl.program_id(1)
    nk = pl.num_programs(1)

    @pl.when(kk == 0)
    def _init():
        wv_acc[...] = jnp.zeros_like(wv_acc)
        z_acc[...] = jnp.zeros_like(z_acc)

    # Skip all compute for (dst, src) tile pairs that contain no edges.
    @pl.when(occ_ref[qi * nk + kk] != 0)
    def _compute():
        q_all = q_ref[...]                                    # [tq, H*D]  bf16
        kv_all = kv_ref[...]                                  # [tk, KW]   bf16
        edge = mask_ref[...] != 0                             # [tq, tk]   bool

        wv_parts = []
        z_parts = []
        # TODO(synk): for H >= 16 accumulate per-head partials directly into
        # lane slices of the scratch (or lax.fori_loop) to bound live vregs.
        for hd in range(H):                        # static unroll over heads
            q_h = q_all[:, hd * D:(hd + 1) * D]                       # [tq, D]
            k_h = kv_all[:, hd * D:(hd + 1) * D]                      # [tk, D]
            v_aug = kv_all[:, HD + hd * (D + 1):HD + (hd + 1) * (D + 1)]  # [tk, D+1]
            # NT matmul (contract last dims) on bf16 operands, f32 accumulate.
            s = lax.dot_general(q_h, k_h, (((1,), (1,)), ((), ())),
                                preferred_element_type=jnp.float32)   # [tq, tk]
            # 1/sqrt(D) already folded into Q; mask via compare+select.
            e = jnp.where(edge, jnp.exp(jnp.clip(s, -5.0, 5.0)), 0.0)
            # e @ [V | 1]: the ones column makes the same MXU matmul emit z as
            # output column D (no XLU row-sum, no broadcast).
            pvz = jnp.dot(e.astype(jnp.bfloat16), v_aug,
                          preferred_element_type=jnp.float32)         # [tq, D+1]
            wv_parts.append(pvz[:, :D])
            z_parts.append(pvz[:, D:])
        wv_acc[...] += jnp.concatenate(wv_parts, axis=-1)             # [tq, H*D]
        z_acc[...] += jnp.concatenate(z_parts, axis=-1)               # [tq, H]

    @pl.when(kk == nk - 1)
    def _finalize():
        outs = []
        for hd in range(H):
            wv_h = wv_acc[:, hd * D:(hd + 1) * D]                     # [tq, D]
            # Guard isolated dst nodes (z == 0): the reference would produce
            # NaN/Inf; with guaranteed self-loops z >= exp(-5) and the guard is
            # a no-op (intentional divergence, documented).
            z_h = jnp.maximum(z_acc[:, hd:hd + 1], 1e-30)             # [tq, 1]
            outs.append(wv_h * pl.reciprocal(z_h, approx=True))
        out_ref[...] = jnp.concatenate(outs, axis=-1)                 # [tq, H*D]


def multi_head_attention_layer(h, Wq, Wk, Wv, bq, bk, bv, mask,
                               *, tq=None, tk=None):
    """h: [N, in_dim]; Wq/Wk/Wv: [H, in_dim, D]; bq/bk/bv: [H, 1, D];
    mask: [N, N] (dst x src), nonzero iff edge src->dst exists.
    Returns head_out: [N, H, D] (== wV / z)."""
    N, in_dim = h.shape
    H, _, D = Wq.shape
    HD = H * D
    KW = HD + H * (D + 1)

    # --- O(N) projections: one wide GEMM each, done once in XLA (per review) ---
    wq = jnp.transpose(Wq, (1, 0, 2)).reshape(in_dim, HD)
    wk = jnp.transpose(Wk, (1, 0, 2)).reshape(in_dim, HD)
    wv = jnp.transpose(Wv, (1, 0, 2)).reshape(in_dim, HD)
    q = (jnp.dot(h, wq) + bq.reshape(1, HD)) * (1.0 / math.sqrt(D))   # scale folded
    k = jnp.dot(h, wk) + bk.reshape(1, HD)
    v = jnp.dot(h, wv) + bv.reshape(1, HD)
    # Append a constant ones column per head to V so the kernel's e @ V matmul
    # also produces z (row-sum of attention scores) as an extra output column.
    v_aug = jnp.concatenate(
        [v.reshape(N, H, D), jnp.ones((N, H, 1), v.dtype)], axis=-1
    ).reshape(N, H * (D + 1))
    kv = jnp.concatenate([k, v_aug], axis=-1).astype(jnp.bfloat16)    # [N, KW]
    q = q.astype(jnp.bfloat16)                                        # [N, H*D]

    # Adjacency mask as int8 (0/1): the only O(N^2) operand, 4x smaller than f32.
    mask_i8 = (mask != 0).astype(jnp.int8)

    # Tile sizes for the O(N^2) score/mask work.  Keep N/tq >= 2 (and ideally
    # even) so v7x's two TensorCores both get dst tiles.
    if tq is None:
        tq = N if N <= 512 else 512
    if tk is None:
        tk = N if N <= 2048 else 2048
    assert N % tq == 0 and N % tk == 0, "N must be divisible by the tile sizes"
    nq, nk = N // tq, N // tk

    # Per-(dst,src) tile occupancy: lets the kernel skip edge-free tile pairs.
    occ = (mask_i8.reshape(nq, tq, nk, tk).max(axis=(1, 3)) > 0).astype(jnp.int32)
    occ = occ.reshape(nq * nk)

    kernel = functools.partial(_graph_attn_kernel, num_heads=H, head_dim=D)

    out = pl.pallas_call(
        kernel,
        out_shape=jax.ShapeDtypeStruct((N, HD), jnp.float32),
        grid_spec=pltpu.PrefetchScalarGridSpec(
            num_scalar_prefetch=1,
            grid=(nq, nk),
            in_specs=[
                pl.BlockSpec((tq, HD), lambda qi, kk, occ: (qi, 0)),   # Q (dst tile)
                pl.BlockSpec((tk, KW), lambda qi, kk, occ: (kk, 0)),   # K|V (src tile)
                pl.BlockSpec((tq, tk), lambda qi, kk, occ: (qi, kk)),  # mask tile
            ],
            out_specs=pl.BlockSpec((tq, HD), lambda qi, kk, occ: (qi, 0)),  # lane-dense
            scratch_shapes=[
                pltpu.VMEM((tq, HD), jnp.float32),   # wV accumulator
                pltpu.VMEM((tq, H), jnp.float32),    # z accumulator (1 col / head)
            ],
        ),
        compiler_params=pltpu.CompilerParams(
            dimension_semantics=("parallel", "arbitrary"),
            vmem_limit_bytes=48 * 1024 * 1024),
        # TODO(synk): on v7x, single-buffer the Q tile (constant across kk) via
        # pipeline_mode=pl.Buffered(1) to reclaim VMEM for larger mask tiles.
    )(occ, q, kv, mask_i8)

    # [N, H*D] -> [N, H, D]: pure reshape, no transpose / extra HBM pass.
    return out.reshape(N, H, D)


def reference(h, Wq, Wk, Wv, bq, bk, bv, mask):
    """Pure-JAX f32 reference mirroring the DGL message passing."""
    H, _, D = Wq.shape
    q = jnp.einsum('ni,hid->hnd', h, Wq) + bq                      # [H, N, D]
    k = jnp.einsum('ni,hid->hnd', h, Wk) + bk
    v = jnp.einsum('ni,hid->hnd', h, Wv) + bv
    s = jnp.einsum('hnd,hmd->hnm', q, k) / math.sqrt(D)            # dst x src
    e = jnp.exp(jnp.clip(s, -5.0, 5.0)) * mask[None]
    wV = jnp.einsum('hnm,hmd->hnd', e, v)                          # [H, N, D]
    z = jnp.sum(e, axis=-1, keepdims=True)                         # [H, N, 1]
    return jnp.transpose(wV / z, (1, 0, 2))                        # [N, H, D]


if __name__ == "__main__":
    # Small deterministic configuration that still exercises a real multi-tile
    # grid (4 dst tiles x 2 src tiles) including init/accumulate/finalize.
    N = 256        # number of graph nodes
    in_dim = 32
    out_dim = 8    # per-head dim D
    num_heads = 4
    use_bias = True

    key = jax.random.PRNGKey(0)
    k_h, k_wq, k_wk, k_wv, k_bq, k_bk, k_bv, k_adj = jax.random.split(key, 8)

    # Node features.
    h = jax.random.normal(k_h, (N, in_dim), dtype=jnp.float32)

    # nn.Linear-style init: U(-1/sqrt(in_dim), 1/sqrt(in_dim)).
    bound = 1.0 / math.sqrt(in_dim)
    def init_w(k):
        return jax.random.uniform(k, (num_heads, in_dim, out_dim),
                                  dtype=jnp.float32, minval=-bound, maxval=bound)
    def init_b(k):
        b = jax.random.uniform(k, (num_heads, 1, out_dim),
                               dtype=jnp.float32, minval=-bound, maxval=bound)
        return b if use_bias else jnp.zeros_like(b)

    Wq, Wk, Wv = init_w(k_wq), init_w(k_wk), init_w(k_wv)
    bq, bk, bv = init_b(k_bq), init_b(k_bk), init_b(k_bv)

    # Random directed graph with self-loops; mask[dst, src] = 1 iff edge src->dst.
    adj = (jax.random.uniform(k_adj, (N, N)) < 0.3).astype(jnp.float32)
    mask = jnp.maximum(adj, jnp.eye(N, dtype=jnp.float32))

    out = multi_head_attention_layer(h, Wq, Wk, Wv, bq, bk, bv, mask, tq=64, tk=128)
    out = jax.block_until_ready(out)

    ref = reference(h, Wq, Wk, Wv, bq, bk, bv, mask)
    # bf16 MXU operands (Q/K/e/V) + approx reciprocal give ~1% relative error
    # vs. the pure-f32 reference; tolerance relaxed per the performance review.
    np.testing.assert_allclose(np.asarray(out), np.asarray(ref),
                               rtol=5e-2, atol=5e-2)
    assert out.shape == (N, num_heads, out_dim)

    print("KERNEL_OK")
</pallas_src>

<mosaic_0001>
module attributes {stable_mosaic.version = 11 : i64} {
  func.func @_graph_attn_kernel(%arg0: i32, %arg1: i32, %arg2: memref<8xi32, #tpu.memory_space<smem>>, %arg3: memref<64x32xbf16, #tpu.memory_space<vmem>>, %arg4: memref<128x68xbf16, #tpu.memory_space<vmem>>, %arg5: memref<64x128xi8, #tpu.memory_space<vmem>>, %arg6: memref<64x32xf32, #tpu.memory_space<vmem>>, %arg7: memref<64x32xf32, #tpu.memory_space<vmem>>, %arg8: memref<64x4xf32, #tpu.memory_space<vmem>>) attributes {dimension_semantics = [#tpu.dimension_semantics<parallel>, #tpu.dimension_semantics<arbitrary>], iteration_bounds = array<i64: 4, 2>, scalar_prefetch = 1 : i64, scratch_operands = 2 : i64, tpu.core_type = #tpu.core_type<tc>, window_params = [{transform_indices = @transform_0, window_bounds = array<i64: 64, 32>}, {transform_indices = @transform_1, window_bounds = array<i64: 128, 68>}, {transform_indices = @transform_2, window_bounds = array<i64: 64, 128>}, {transform_indices = @transform_3, window_bounds = array<i64: 64, 32>}]} {
    %c0_i32 = arith.constant 0 : i32
    %0 = arith.cmpi eq, %arg1, %c0_i32 : i32
    %1 = arith.extui %0 : i1 to i32
    %c0_i32_0 = arith.constant 0 : i32
    %2 = arith.cmpi ne, %1, %c0_i32_0 : i32
    scf.if %2 {
      %cst = arith.constant 0.000000e+00 : f32
      %13 = vector.broadcast %cst : f32 to vector<64x32xf32>
      %c0 = arith.constant 0 : index
      %c0_4 = arith.constant 0 : index
      %14 = vector.load %arg7[%c0, %c0_4] : memref<64x32xf32, #tpu.memory_space<vmem>>, vector<64x32xf32>
      tpu.vector_store %arg7[%c0, %c0_4], %13 {strides = array<i32>} : memref<64x32xf32, #tpu.memory_space<vmem>>, vector<64x32xf32>,
      %cst_5 = arith.constant 0.000000e+00 : f32
      %15 = vector.broadcast %cst_5 : f32 to vector<64x4xf32>
      %c0_6 = arith.constant 0 : index
      %c0_7 = arith.constant 0 : index
      %16 = vector.load %arg8[%c0_6, %c0_7] : memref<64x4xf32, #tpu.memory_space<vmem>>, vector<64x4xf32>
      tpu.vector_store %arg8[%c0_6, %c0_7], %15 {strides = array<i32>} : memref<64x4xf32, #tpu.memory_space<vmem>>, vector<64x4xf32>,
    } else {
    }
    %c2_i32 = arith.constant 2 : i32
    %3 = arith.muli %arg0, %c2_i32 : i32
    %4 = arith.addi %3, %arg1 : i32
    %5 = arith.index_cast %4 : i32 to index
    %6 = memref.load %arg2[%5] : memref<8xi32, #tpu.memory_space<smem>>
    %c0_i32_1 = arith.constant 0 : i32
    %7 = arith.cmpi ne, %6, %c0_i32_1 : i32
    %8 = arith.extui %7 : i1 to i32
    %c0_i32_2 = arith.constant 0 : i32
    %9 = arith.cmpi ne, %8, %c0_i32_2 : i32
    scf.if %9 {
      %c0 = arith.constant 0 : index
      %c0_4 = arith.constant 0 : index
      %13 = vector.load %arg3[%c0, %c0_4] : memref<64x32xbf16, #tpu.memory_space<vmem>>, vector<64x32xbf16>
      %c0_5 = arith.constant 0 : index
      %c0_6 = arith.constant 0 : index
      %14 = vector.load %arg4[%c0_5, %c0_6] : memref<128x68xbf16, #tpu.memory_space<vmem>>, vector<128x68xbf16>
      %c0_7 = arith.constant 0 : index
      %c0_8 = arith.constant 0 : index
      %15 = vector.load %arg5[%c0_7, %c0_8] : memref<64x128xi8, #tpu.memory_space<vmem>>, vector<64x128xi8>
      %c0_i8 = arith.constant 0 : i8
      %16 = vector.broadcast %c0_i8 : i8 to vector<64x128xi8>
      %17 = arith.cmpi ne, %15, %16 : vector<64x128xi8>
      %18 = vector.extract_strided_slice %13 {offsets = [0, 0], sizes = [64, 8], strides = [1, 1]} : vector<64x32xbf16> to vector<64x8xbf16>
      %19 = vector.extract_strided_slice %14 {offsets = [0, 0], sizes = [128, 8], strides = [1, 1]} : vector<128x68xbf16> to vector<128x8xbf16>
      %20 = vector.extract_strided_slice %14 {offsets = [0, 32], sizes = [128, 9], strides = [1, 1]} : vector<128x68xbf16> to vector<128x9xbf16>
      %cst = arith.constant dense<0.000000e+00> : vector<64x128xf32>
      %21 = tpu.matmul %18, %19, %cst {dimension_numbers = #tpu.dot_dimension_numbers<[1], [1], [0], [0], [0, 0, 1, 0], [], []>} : vector<64x8xbf16>, vector<128x8xbf16>, vector<64x128xf32> -> vector<64x128xf32>
      %cst_9 = arith.constant -5.000000e+00 : f32
      %cst_10 = arith.constant 5.000000e+00 : f32
      %22 = vector.broadcast %cst_9 : f32 to vector<64x128xf32>
      %23 = arith.maximumf %22, %21 : vector<64x128xf32>
      %24 = vector.broadcast %cst_10 : f32 to vector<64x128xf32>
      %25 = arith.minimumf %24, %23 : vector<64x128xf32>
      %26 = math.exp %25 : vector<64x128xf32>
      %cst_11 = arith.constant 0.000000e+00 : f32
      %27 = vector.broadcast %cst_11 : f32 to vector<64x128xf32>
      %28 = arith.select %17, %26, %27 : vector<64x128xi1>, vector<64x128xf32>
      %29 = arith.truncf %28 : vector<64x128xf32> to vector<64x128xbf16>
      %cst_12 = arith.constant dense<0.000000e+00> : vector<64x9xf32>
      %30 = tpu.matmul %29, %20, %cst_12 {dimension_numbers = #tpu.dot_dimension_numbers<[1], [0], [0], [1], [0, 0, 1, 1], [], []>} : vector<64x128xbf16>, vector<128x9xbf16>, vector<64x9xf32> -> vector<64x9xf32>
      %31 = vector.extract_strided_slice %30 {offsets = [0, 0], sizes = [64, 8], strides = [1, 1]} : vector<64x9xf32> to vector<64x8xf32>
      %32 = vector.extract_strided_slice %30 {offsets = [0, 8], sizes = [64, 1], strides = [1, 1]} : vector<64x9xf32> to vector<64x1xf32>
      %33 = vector.extract_strided_slice %13 {offsets = [0, 8], sizes = [64, 8], strides = [1, 1]} : vector<64x32xbf16> to vector<64x8xbf16>
      %34 = vector.extract_strided_slice %14 {offsets = [0, 8], sizes = [128, 8], strides = [1, 1]} : vector<128x68xbf16> to vector<128x8xbf16>
      %35 = vector.extract_strided_slice %14 {offsets = [0, 41], sizes = [128, 9], strides = [1, 1]} : vector<128x68xbf16> to vector<128x9xbf16>
      %cst_13 = arith.constant dense<0.000000e+00> : vector<64x128xf32>
      %36 = tpu.matmul %33, %34, %cst_13 {dimension_numbers = #tpu.dot_dimension_numbers<[1], [1], [0], [0], [0, 0, 1, 0], [], []>} : vector<64x8xbf16>, vector<128x8xbf16>, vector<64x128xf32> -> vector<64x128xf32>
      %cst_14 = arith.constant -5.000000e+00 : f32
      %cst_15 = arith.constant 5.000000e+00 : f32
      %37 = vector.broadcast %cst_14 : f32 to vector<64x128xf32>
      %38 = arith.maximumf %37, %36 : vector<64x128xf32>
      %39 = vector.broadcast %cst_15 : f32 to vector<64x128xf32>
      %40 = arith.minimumf %39, %38 : vector<64x128xf32>
      %41 = math.exp %40 : vector<64x128xf32>
      %cst_16 = arith.constant 0.000000e+00 : f32
      %42 = vector.broadcast %cst_16 : f32 to vector<64x128xf32>
      %43 = arith.select %17, %41, %42 : vector<64x128xi1>, vector<64x128xf32>
      %44 = arith.truncf %43 : vector<64x128xf32> to vector<64x128xbf16>
      %cst_17 = arith.constant dense<0.000000e+00> : vector<64x9xf32>
      %45 = tpu.matmul %44, %35, %cst_17 {dimension_numbers = #tpu.dot_dimension_numbers<[1], [0], [0], [1], [0, 0, 1, 1], [], []>} : vector<64x128xbf16>, vector<128x9xbf16>, vector<64x9xf32> -> vector<64x9xf32>
      %46 = vector.extract_strided_slice %45 {offsets = [0, 0], sizes = [64, 8], strides = [1, 1]} : vector<64x9xf32> to vector<64x8xf32>
      %47 = vector.extract_strided_slice %45 {offsets = [0, 8], sizes = [64, 1], strides = [1, 1]} : vector<64x9xf32> to vector<64x1xf32>
      %48 = vector.extract_strided_slice %13 {offsets = [0, 16], sizes = [64, 8], strides = [1, 1]} : vector<64x32xbf16> to vector<64x8xbf16>
      %49 = vector.extract_strided_slice %14 {offsets = [0, 16], sizes = [128, 8], strides = [1, 1]} : vector<128x68xbf16> to vector<128x8xbf16>
      %50 = vector.extract_strided_slice %14 {offsets = [0, 50], sizes = [128, 9], strides = [1, 1]} : vector<128x68xbf16> to vector<128x9xbf16>
      %cst_18 = arith.constant dense<0.000000e+00> : vector<64x128xf32>
      %51 = tpu.matmul %48, %49, %cst_18 {dimension_numbers = #tpu.dot_dimension_numbers<[1], [1], [0], [0], [0, 0, 1, 0], [], []>} : vector<64x8xbf16>, vector<128x8xbf16>, vector<64x128xf32> -> vector<64x128xf32>
      %cst_19 = arith.constant -5.000000e+00 : f32
      %cst_20 = arith.constant 5.000000e+00 : f32
      %52 = vector.broadcast %cst_19 : f32 to vector<64x128xf32>
      %53 = arith.maximumf %52, %51 : vector<64x128xf32>
      %54 = vector.broadcast %cst_20 : f32 to vector<64x128xf32>
      %55 = arith.minimumf %54, %53 : vector<64x128xf32>
      %56 = math.exp %55 : vector<64x128xf32>
      %cst_21 = arith.constant 0.000000e+00 : f32
      %57 = vector.broadcast %cst_21 : f32 to vector<64x128xf32>
      %58 = arith.select %17, %56, %57 : vector<64x128xi1>, vector<64x128xf32>
      %59 = arith.truncf %58 : vector<64x128xf32> to vector<64x128xbf16>
      %cst_22 = arith.constant dense<0.000000e+00> : vector<64x9xf32>
      %60 = tpu.matmul %59, %50, %cst_22 {dimension_numbers = #tpu.dot_dimension_numbers<[1], [0], [0], [1], [0, 0, 1, 1], [], []>} : vector<64x128xbf16>, vector<128x9xbf16>, vector<64x9xf32> -> vector<64x9xf32>
      %61 = vector.extract_strided_slice %60 {offsets = [0, 0], sizes = [64, 8], strides = [1, 1]} : vector<64x9xf32> to vector<64x8xf32>
      %62 = vector.extract_strided_slice %60 {offsets = [0, 8], sizes = [64, 1], strides = [1, 1]} : vector<64x9xf32> to vector<64x1xf32>
      %63 = vector.extract_strided_slice %13 {offsets = [0, 24], sizes = [64, 8], strides = [1, 1]} : vector<64x32xbf16> to vector<64x8xbf16>
      %64 = vector.extract_strided_slice %14 {offsets = [0, 24], sizes = [128, 8], strides = [1, 1]} : vector<128x68xbf16> to vector<128x8xbf16>
      %65 = vector.extract_strided_slice %14 {offsets = [0, 59], sizes = [128, 9], strides = [1, 1]} : vector<128x68xbf16> to vector<128x9xbf16>
      %cst_23 = arith.constant dense<0.000000e+00> : vector<64x128xf32>
      %66 = tpu.matmul %63, %64, %cst_23 {dimension_numbers = #tpu.dot_dimension_numbers<[1], [1], [0], [0], [0, 0, 1, 0], [], []>} : vector<64x8xbf16>, vector<128x8xbf16>, vector<64x128xf32> -> vector<64x128xf32>
      %cst_24 = arith.constant -5.000000e+00 : f32
      %cst_25 = arith.constant 5.000000e+00 : f32
      %67 = vector.broadcast %cst_24 : f32 to vector<64x128xf32>
      %68 = arith.maximumf %67, %66 : vector<64x128xf32>
      %69 = vector.broadcast %cst_25 : f32 to vector<64x128xf32>
      %70 = arith.minimumf %69, %68 : vector<64x128xf32>
      %71 = math.exp %70 : vector<64x128xf32>
      %cst_26 = arith.constant 0.000000e+00 : f32
      %72 = vector.broadcast %cst_26 : f32 to vector<64x128xf32>
      %73 = arith.select %17, %71, %72 : vector<64x128xi1>, vector<64x128xf32>
      %74 = arith.truncf %73 : vector<64x128xf32> to vector<64x128xbf16>
      %cst_27 = arith.constant dense<0.000000e+00> : vector<64x9xf32>
      %75 = tpu.matmul %74, %65, %cst_27 {dimension_numbers = #tpu.dot_dimension_numbers<[1], [0], [0], [1], [0, 0, 1, 1], [], []>} : vector<64x128xbf16>, vector<128x9xbf16>, vector<64x9xf32> -> vector<64x9xf32>
      %76 = vector.extract_strided_slice %75 {offsets = [0, 0], sizes = [64, 8], strides = [1, 1]} : vector<64x9xf32> to vector<64x8xf32>
      %77 = vector.extract_strided_slice %75 {offsets = [0, 8], sizes = [64, 1], strides = [1, 1]} : vector<64x9xf32> to vector<64x1xf32>
      %c0_28 = arith.constant 0 : index
      %c0_29 = arith.constant 0 : index
      %78 = vector.load %arg7[%c0_28, %c0_29] : memref<64x32xf32, #tpu.memory_space<vmem>>, vector<64x32xf32>
      %79 = tpu.concatenate %31, %46, %61, %76 in 1 : vector<64x8xf32>, vector<64x8xf32>, vector<64x8xf32>, vector<64x8xf32> -> vector<64x32xf32>
      %80 = arith.addf %78, %79 : vector<64x32xf32>
      %c0_30 = arith.constant 0 : index
      %c0_31 = arith.constant 0 : index
      %81 = vector.load %arg7[%c0_30, %c0_31] : memref<64x32xf32, #tpu.memory_space<vmem>>, vector<64x32xf32>
      tpu.vector_store %arg7[%c0_30, %c0_31], %80 {strides = array<i32>} : memref<64x32xf32, #tpu.memory_space<vmem>>, vector<64x32xf32>,
      %c0_32 = arith.constant 0 : index
      %c0_33 = arith.constant 0 : index
      %82 = vector.load %arg8[%c0_32, %c0_33] : memref<64x4xf32, #tpu.memory_space<vmem>>, vector<64x4xf32>
      %83 = tpu.concatenate %32, %47, %62, %77 in 1 : vector<64x1xf32>, vector<64x1xf32>, vector<64x1xf32>, vector<64x1xf32> -> vector<64x4xf32>
      %84 = arith.addf %82, %83 : vector<64x4xf32>
      %c0_34 = arith.constant 0 : index
      %c0_35 = arith.constant 0 : index
      %85 = vector.load %arg8[%c0_34, %c0_35] : memref<64x4xf32, #tpu.memory_space<vmem>>, vector<64x4xf32>
      tpu.vector_store %arg8[%c0_34, %c0_35], %84 {strides = array<i32>} : memref<64x4xf32, #tpu.memory_space<vmem>>, vector<64x4xf32>,
    } else {
    }
    %c1_i32 = arith.constant 1 : i32
    %10 = arith.cmpi eq, %arg1, %c1_i32 : i32
    %11 = arith.extui %10 : i1 to i32
    %c0_i32_3 = arith.constant 0 : i32
    %12 = arith.cmpi ne, %11, %c0_i32_3 : i32
    scf.if %12 {
      %c0 = arith.constant 0 : index
      %c0_4 = arith.constant 0 : index
      %13 = vector.load %arg7[%c0, %c0_4] : memref<64x32xf32, #tpu.memory_space<vmem>>, vector<64x8xf32>
      %c0_5 = arith.constant 0 : index
      %c0_6 = arith.constant 0 : index
      %14 = vector.load %arg8[%c0_5, %c0_6] : memref<64x4xf32, #tpu.memory_space<vmem>>, vector<64x1xf32>
      %cst = arith.constant 1.000000e-30 : f32
      %15 = vector.broadcast %cst : f32 to vector<64x1xf32>
      %16 = arith.maximumf %14, %15 : vector<64x1xf32>
      %17 = tpu.reciprocal %16 {approx = true} : vector<64x1xf32> -> vector<64x1xf32>
      %18 = vector.broadcast %17 : vector<64x1xf32> to vector<64x8xf32>
      %19 = arith.mulf %13, %18 : vector<64x8xf32>
      %c0_7 = arith.constant 0 : index
      %c8 = arith.constant 8 : index
      %20 = vector.load %arg7[%c0_7, %c8] : memref<64x32xf32, #tpu.memory_space<vmem>>, vector<64x8xf32>
      %c0_8 = arith.constant 0 : index
      %c1 = arith.constant 1 : index
      %21 = vector.load %arg8[%c0_8, %c1] : memref<64x4xf32, #tpu.memory_space<vmem>>, vector<64x1xf32>
      %cst_9 = arith.constant 1.000000e-30 : f32
      %22 = vector.broadcast %cst_9 : f32 to vector<64x1xf32>
      %23 = arith.maximumf %21, %22 : vector<64x1xf32>
      %24 = tpu.reciprocal %23 {approx = true} : vector<64x1xf32> -> vector<64x1xf32>
      %25 = vector.broadcast %24 : vector<64x1xf32> to vector<64x8xf32>
      %26 = arith.mulf %20, %25 : vector<64x8xf32>
      %c0_10 = arith.constant 0 : index
      %c16 = arith.constant 16 : index
      %27 = vector.load %arg7[%c0_10, %c16] : memref<64x32xf32, #tpu.memory_space<vmem>>, vector<64x8xf32>
      %c0_11 = arith.constant 0 : index
      %c2 = arith.constant 2 : index
      %28 = vector.load %arg8[%c0_11, %c2] : memref<64x4xf32, #tpu.memory_space<vmem>>, vector<64x1xf32>
      %cst_12 = arith.constant 1.000000e-30 : f32
      %29 = vector.broadcast %cst_12 : f32 to vector<64x1xf32>
      %30 = arith.maximumf %28, %29 : vector<64x1xf32>
      %31 = tpu.reciprocal %30 {approx = true} : vector<64x1xf32> -> vector<64x1xf32>
      %32 = vector.broadcast %31 : vector<64x1xf32> to vector<64x8xf32>
      %33 = arith.mulf %27, %32 : vector<64x8xf32>
      %c0_13 = arith.constant 0 : index
      %c24 = arith.constant 24 : index
      %34 = vector.load %arg7[%c0_13, %c24] : memref<64x32xf32, #tpu.memory_space<vmem>>, vector<64x8xf32>
      %c0_14 = arith.constant 0 : index
      %c3 = arith.constant 3 : index
      %35 = vector.load %arg8[%c0_14, %c3] : memref<64x4xf32, #tpu.memory_space<vmem>>, vector<64x1xf32>
      %cst_15 = arith.constant 1.000000e-30 : f32
      %36 = vector.broadcast %cst_15 : f32 to vector<64x1xf32>
      %37 = arith.maximumf %35, %36 : vector<64x1xf32>
      %38 = tpu.reciprocal %37 {approx = true} : vector<64x1xf32> -> vector<64x1xf32>
      %39 = vector.broadcast %38 : vector<64x1xf32> to vector<64x8xf32>
      %40 = arith.mulf %34, %39 : vector<64x8xf32>
      %41 = tpu.concatenate %19, %26, %33, %40 in 1 : vector<64x8xf32>, vector<64x8xf32>, vector<64x8xf32>, vector<64x8xf32> -> vector<64x32xf32>
      %c0_16 = arith.constant 0 : index
      %c0_17 = arith.constant 0 : index
      %42 = vector.load %arg6[%c0_16, %c0_17] : memref<64x32xf32, #tpu.memory_space<vmem>>, vector<64x32xf32>
      tpu.vector_store %arg6[%c0_16, %c0_17], %41 {strides = array<i32>} : memref<64x32xf32, #tpu.memory_space<vmem>>, vector<64x32xf32>,
    } else {
    }
    return
  }
  func.func @transform_0(%arg0: i32, %arg1: i32, %arg2: memref<8xi32, #tpu.memory_space<smem>>) -> (i32, i32) {
    %c0_i32 = arith.constant 0 : i32
    %c0_i32_0 = arith.constant 0 : i32
    return %arg0, %c0_i32 : i32, i32
  }
  func.func @transform_1(%arg0: i32, %arg1: i32, %arg2: memref<8xi32, #tpu.memory_space<smem>>) -> (i32, i32) {
    %c0_i32 = arith.constant 0 : i32
    %c0_i32_0 = arith.constant 0 : i32
    return %arg1, %c0_i32 : i32, i32
  }
  func.func @transform_2(%arg0: i32, %arg1: i32, %arg2: memref<8xi32, #tpu.memory_space<smem>>) -> (i32, i32) {
    %c0_i32 = arith.constant 0 : i32
    return %arg0, %arg1 : i32, i32
  }
  func.func @transform_3(%arg0: i32, %arg1: i32, %arg2: memref<8xi32, #tpu.memory_space<smem>>) -> (i32, i32) {
    %c0_i32 = arith.constant 0 : i32
    %c0_i32_0 = arith.constant 0 : i32
    return %arg0, %c0_i32 : i32, i32
  }
}

</mosaic_0001>

<bundles_post_ra>
// kernel: tpu_custom_call.1
= control target key start
LH: loop header
LB: loop body
LE: loop exit
PB: predicated region body
PF: predicated region fallthrough
CT: control target
= control target key end

     0   :  { %s3665_s0 = inlined_call_operand.vmem [shape: s32[8], index: 0, kind: input, shape index: {}]   ;;  %s3666_s1 = inlined_call_operand.vmem [shape: bf16[256,32], index: 1, kind: input, shape index: {}]   ;;  %s3667_s2 = inlined_call_operand.vmem [shape: bf16[256,68], index: 2, kind: input, shape index: {}]   ;;  %s3668_s3 = inlined_call_operand.vmem [shape: s8[256,256], index: 3, kind: input, shape index: {}]   ;;  %s3669_s4 = inlined_call_operand.vmem [shape: f32[256,32], index: 4, kind: output, shape index: {}]  }
   0x1   :  { %s9_s17 = sshll.u32 %s3665_s0, 4  ;;  %s10_s17 = int_to_ptr.vmem [resolvable:$true] %s9_s17 }
   0x2   :  { %s2737_s18 = scalar_lea.vmem %s10_s17, 16  ;;  %p2742_p1 = scmp.lt.s32.totalorder %s10_s17, %s10_s17 }
   0x3   :  { %p2738_p0 = scmp.ne.s32.totalorder %s10_s17, %s2737_s18  ;;  %p2743_p2 = scmp.lt.s32.totalorder %s2737_s18, %s2737_s18 }
   0x5   :  { %p2744_p3 = por %p2743_p2, %p2742_p1 }
   0x7   :  { %p2745_p4 = pnand %p2744_p3, %p2738_p0 }
   0x9   :  { %2748 = shalt.err (!%p2745_p4)  }
   0xa   :  { %s2807_s19 = smov [#allocation5]  }
   0xb   :  { %12 = dma.vmem_to_smem %s10_s17, 16, %s2807_s19, [#allocation4] }
   0xc   :  { %2777 = dma.done.wait [#allocation4], 16 }
   0xd   :  { %2778 = vsyncadd [#allocation4], 4294967280 }
   0xe   :  { %14 = sfence }
   0xf   :  { %s2855_s20 = smov 0   ;;  %s2857_s21 = smov 0  }
  0x10   :  { %s2859_s22 = smov 0   ;;  %s2861_s0 = smov 0  }
  0x11   :  { %s2863_s23 = smov 0   ;;  %s2865_s24 = smov 0  }
  0x12   :  { %s2867_s25 = smov 0  }
  0x13 LB: > { %s29_s26 = sadd.s32 1, %s2797_s23  ;;  %s32_s27 = sadd.s32 1, %s2801_s24  ;;  %s2805_s25 = sphi %s2867_s25, %s20_s25   ;;  %s2801_s24 = sphi %s2865_s24, %s3691_s24   ;;  %s2797_s23 = sphi %s2863_s23, %s3690_s23   ;;  %s2793_s0 = sphi %s2861_s0, %s3689_s0   ;;  %s2789_s22 = sphi %s2859_s22, %s3688_s22   ;;  %s2785_s21 = sphi %s2857_s21, %s3687_s21   ;;  %s2781_s20 = sphi %s2855_s20, %s3686_s20  }
  0x14   : > { %p30_p5 = scmp.ge.s32.totalorder %s29_s26, 2  ;;  %p100_p6 = scmp.ne.s32.totalorder %s2785_s21, %s2781_s20 }
  0x15   : > { %p101_p7 = scmp.eq.s32.totalorder %s2805_s25, 0  ;;  %s93_s5 = sadd.s32 1, %s2785_s21 }
  0x16   : > { %s3693_s26 = smov (%p30_p5, %s29_s26), 0  ;;  %s3695_s27 = smov (!%p30_p5, %s32_s27), %s2801_s24 }
  0x17   : > { %p102_p8 = por %p101_p7, %p100_p6  ;;  %p34_p9 = scmp.ge.s32.totalorder %s3695_s27, 4 }
  0x18   : > { %s89_s28 = ssub.s32 %s2797_s23, %s3693_s26  ;;  %p2113_p11 = scmp.ge.s32.totalorder %s2805_s25, 8 }
  0x19   : > { %s3697_s27 = smov (%p34_p9, %s3695_s27), 0 }
  0x1a   : > { %s88_s29 = ssub.s32 %s2801_s24, %s3697_s27  ;;  %152 = sbr.rel (%p2113_p11) target bundleno = 38 (0x26), region = 16 }
  0x1b   : > { %s90_s30 = sor.u32 %s89_s28, %s88_s29 }
  0x1c   : > { %p91_p10 = scmp.eq.s32.totalorder %s90_s30, 0 }
  0x1e   : > { %s2906_s6 = scalar_select %p91_p10, %s2785_s21, %s93_s5  }
  0x1f   : > { %173 = sbr.rel (!%p102_p8) target bundleno = 38 (0x26), region = 28  ;;  %s175_s7 = sand.u32 (%p102_p8), 1, %s2785_s21  }
  0x20   : > { %s2240_s8 = sshll.u32 (%p102_p8), %s2801_s24, 2  ;;  %s2114_s9 = sshll.u32 (%p102_p8), %s175_s7, 4 }
  0x21   : > { %s180_s10 = sadd.s32 (%p102_p8), %s2797_s23, %s2240_s8  ;;  %s177_s15 = scalar_lea.vmem (%p102_p8), [#allocation6], %s2114_s9 }
  0x22   : > { %s2117_s11 = sshll.u32 (%p102_p8), %s180_s10, 3 }
  0x23   : > { %s182_s14 = scalar_lea.vmem (%p102_p8), %s3668_s3, %s2117_s11 }
  0x24   : > { %v213_v0 = vld [vmem:[%s182_s14] sm:$0xff]  ;;  %v215_v1 = vld [vmem:[%s182_s14 + $0x10] sm:$0xff] }
  0x25   : > { %214 = vst [vmem:[%s177_s15] sm:$0xff] %v213_v0  ;;  %216 = vst [vmem:[%s177_s15 + $0x8] sm:$0xff] %v215_v1 }
  0x26 PF: > { %p2118_p12 = scmp.ge.s32.totalorder %s2805_s25, 1  ;;  %p221_p13 = scmp.lt.s32.totalorder %s2805_s25, 9 }
  0x28   : > { %p222_p0 = pnand %p2118_p12, %p221_p13 }
  0x29   : > { %s228_s16 = sand.u32 (!%p222_p0), 1, %s2781_s20   ;;  %s2120_s17 = sshll.u32 (!%p222_p0), %s2793_s0, 3 }
  0x2a   : > { %225 = sbr.rel (%p222_p0) target bundleno = 1779 (0x6f3), region = 66  ;;  %s2919_s18 = sshll.u32 (!%p222_p0), %s228_s16, 4 }
  0x2b   : > { %p262_p1 = scmp.lt.s32.totalorder (!%p222_p0), %s2120_s17, 31  ;;  %s2122_s19 = sshll.u32 (!%p222_p0), %s2789_s22, 4 }
  0x2c   : > { %p268_p2 = scmp.lt.s32.totalorder (!%p222_p0), %s2122_s19, 31  ;;  %s230_s14 = scalar_lea.vmem (!%p222_p0), [#allocation6], %s2919_s18 }
  0x2d   : > { %p2126_p3 = scmp.ne.s32.totalorder (!%p222_p0), %s2789_s22, 0 }
  0x2f   : > { %s3699_s17 = smov (!%p262_p1, %s2120_s17), 31  ;;  %s3701_s19 = smov (!%p268_p2, %s2122_s19), 31 }
  0x30   : > { %s2121_s28 = sshll.u32 %s3699_s17, 2  ;;  %s2125_s29 = sshll.u32 %s3699_s17, 3 }
  0x31   : > { %s2925_s7 = scalar_lea.vmem %s3666_s1, %s2121_s28  ;;  %s2930_s10 = scalar_lea.vmem %s3669_s4, %s2125_s29 }
  0x32   : > { %s2123_s20 = sshll.u32 %s3701_s19, 2  ;;  %286 = sbr.rel (%p2126_p3) target bundleno = 64 (0x40), region = 74 }
  0x33   : > { %s2935_s13 = scalar_lea.vmem %s3667_s2, %s2123_s20 }
  0x37   : > { %vm287_vm0 = vcmask 261120   ;;  %vm296_vm1 = vcmask 31744   ;;  %v2808_v2 = vmov 0.0  }
  0x38   : > { %288 = vst.msk [vmem:[#allocation2] sm:$0xff] %vm287_vm0, %v2808_v2  ;;  %289 = vst.msk [vmem:[#allocation2 + $0x8] sm:$0xff] %vm287_vm0, %v2808_v2 }
  0x39   : > { %290 = vst.msk [vmem:[#allocation2 + $0x10] sm:$0xff] %vm287_vm0, %v2808_v2  ;;  %291 = vst.msk [vmem:[#allocation2 + $0x18] sm:$0xff] %vm287_vm0, %v2808_v2 }
  0x3a   : > { %292 = vst.msk [vmem:[#allocation2 + $0x20] sm:$0xff] %vm287_vm0, %v2808_v2  ;;  %293 = vst.msk [vmem:[#allocation2 + $0x28] sm:$0xff] %vm287_vm0, %v2808_v2 }
  0x3b   : > { %294 = vst.msk [vmem:[#allocation2 + $0x30] sm:$0xff] %vm287_vm0, %v2808_v2  ;;  %295 = vst.msk [vmem:[#allocation2 + $0x38] sm:$0xff] %vm287_vm0, %v2808_v2 }
  0x3c   : > { %297 = vst.msk [vmem:[#allocation3] sm:$0xff] %vm296_vm1, %v2808_v2  ;;  %298 = vst.msk [vmem:[#allocation3 + $0x8] sm:$0xff] %vm296_vm1, %v2808_v2 }
  0x3d   : > { %299 = vst.msk [vmem:[#allocation3 + $0x10] sm:$0xff] %vm296_vm1, %v2808_v2  ;;  %300 = vst.msk [vmem:[#allocation3 + $0x18] sm:$0xff] %vm296_vm1, %v2808_v2 }
  0x3e   : > { %301 = vst.msk [vmem:[#allocation3 + $0x20] sm:$0xff] %vm296_vm1, %v2808_v2  ;;  %302 = vst.msk [vmem:[#allocation3 + $0x28] sm:$0xff] %vm296_vm1, %v2808_v2 }
  0x3f   : > { %303 = vst.msk [vmem:[#allocation3 + $0x30] sm:$0xff] %vm296_vm1, %v2808_v2  ;;  %304 = vst.msk [vmem:[#allocation3 + $0x38] sm:$0xff] %vm296_vm1, %v2808_v2 }
  0x40 PF: > { %s2127_s15 = sshll.u32 %s2793_s0, 1 }
  0x41   : > { %s306_s16 = sadd.s32 %s2789_s22, %s2127_s15 }
  0x42   : > { %s307_s17 = sld [smem:[#allocation5 + %s306_s16]] }
  0x48   : > { %p2128_p4 = scmp.eq.s32.totalorder %s307_s17, 0 }
  0x49   : > { %s2809_s0 = smov (!%p2128_p4), 96   ;;  %s2810_s19 = smov (!%p2128_p4), 120  }
  0x4a   : > { %311 = sbr.rel (%p2128_p4) target bundleno = 1560 (0x618), region = 78  ;;  %s2811_s28 = smov (!%p2128_p4), 87  }
  0x4b   : > { %s2812_s29 = smov (!%p2128_p4), 112   ;;  %s2814_s18 = smov (!%p2128_p4), 78  }
  0x4c   : > { %s2815_s30 = smov (!%p2128_p4), 104   ;;  %s2816_s5 = smov (!%p2128_p4), 69  }
  0x4d   : > { %s2818_s8 = smov (!%p2128_p4), 121   ;;  %s2819_s9 = smov (!%p2128_p4), 16  }
  0x4e   : > { %s2820_s20 = smov (!%p2128_p4), 122   ;;  %s2821_s11 = smov (!%p2128_p4), 24  }
  0x4f   : > { %v2950_v3 = vld [vmem:[%s2935_s13 + $0x38] sm:$0xff]   ;;  %vm400_vm2 = vcmask 64512   ;;  %v2953_v4 = vld [vmem:[%s2935_s13 + $0x30] sm:$0xff]   ;;  %v2960_v6 = vld [vmem:[%s2935_s13 + $0x28] sm:$0xff]   ;;  %v2813_v33 = vmov 0   ;;  %s2822_s12 = smov 123  }
  0x50   : > { %2529 = vmatprep.subr.msk.bf16.mxu0 %vm400_vm2, %v2950_v3  ;;  %v435_v5 = vsel %vm400_vm2, %v2950_v3, 0  ;;  %618 = vrot.lane.b32.xlu0 %v2950_v3, %s2809_s0  ;;  %v2967_v7 = vld [vmem:[%s2935_s13 + $0x20] sm:$0xff]   ;;  %v2971_v8 = vld [vmem:[%s2935_s13 + $0x18] sm:$0xff]   ;;  %v432_v9 = vsel %vm400_vm2, %v2953_v4, 0  ;;  %v2980_v11 = vld [vmem:[%s2935_s13 + $0x10] sm:$0xff]   ;;  %v429_v14 = vsel %vm400_vm2, %v2960_v6, 0 }
  0x51   : > { %2338 = vmatpush3.bf16.xpose.msra.mxu0 %v435_v5  ;;  %614 = vrot.lane.b32.xlu1 %v2960_v6, %s2809_s0  ;;  %v2976_v10 = vld [vmem:[%s2925_s7] sm:$0xff]   ;;  %v2988_v12 = vld [vmem:[%s2935_s13 + $0x8] sm:$0xff]   ;;  %v426_v15 = vsel %vm400_vm2, %v2967_v7, 0  ;;  %v423_v16 = vsel %vm400_vm2, %v2971_v8, 0  ;;  %v3030_v18 = vld [vmem:[%s2925_s7 + $0x10] sm:$0xff]   ;;  %v420_v20 = vsel %vm400_vm2, %v2980_v11, 0 }
  0x52   : > { %2530 = vmatprep.subr.msk.bf16.mxu0 %vm400_vm2, %v2953_v4  ;;  %2353 = vmatprep.mubr.msk.bf16.mxu0 %vm400_vm2, %v2976_v10  ;;  %v2992_v13 = vld [vmem:[%s2935_s13] sm:$0xff]   ;;  %v3023_v17 = vld [vmem:[%s2925_s7 + $0x8] sm:$0xff]   ;;  %v3035_v19 = vld [vmem:[%s2925_s7 + $0x18] sm:$0xff]   ;;  %v417_v21 = vsel %vm400_vm2, %v2988_v12, 0  ;;  %s2817_s7 = smov 8  }
  0x53   : > { %v414_v22 = vsel %vm400_vm2, %v2992_v13, 0  ;;  %v336_v32 = vld [vmem:[%s230_s14] sm:$0xff]  ;;  %v337_v37 = vld [vmem:[%s230_s14 + $0x8] sm:$0xff] }
  0x54   : > { %616 = vrot.lane.b32.xlu0 %v2953_v4, %s2809_s0  ;;  %vm338_vm3 = vnez %v336_v32  ;;  %vm339_vm4 = vnez %v337_v37 }
  0x55   : > { %612 = vrot.lane.b32.xlu1 %v2967_v7, %s2809_s0  ;;  %v534_v34 = vsel %vm338_vm3, 16843009, %v2813_v33  ;;  %v535_v47 = vsel %vm339_vm4, 16843009, %v2813_v33 }
  0x56   : > { %v536_v35 = vunpack.c.0.s8 %v534_v34  ;;  %v537_v36 = vunpack.c.1.s8 %v534_v34  ;;  %v538_v38 = vunpack.c.2.s8 %v534_v34  ;;  %v539_v39 = vunpack.c.3.s8 %v534_v34 }
  0x57   : > { %v540_v57 = vunpack.c.0.s8 %v535_v47  ;;  %v541_v60 = vunpack.c.1.s8 %v535_v47  ;;  %v542_v0 = vunpack.c.2.s8 %v535_v47  ;;  %v543_v1 = vunpack.c.3.s8 %v535_v47 }
  0x58   : > { %610 = vrot.lane.b32.xlu0 %v2971_v8, %s2809_s0  ;;  %v544_v41 = vpack.c.b16 %v536_v35, %v536_v35  ;;  %v546_v42 = vpack.c.b16 %v537_v36, %v537_v36  ;;  %v548_v44 = vpack.c.b16 %v538_v38, %v538_v38  ;;  %v550_v45 = vpack.c.b16 %v539_v39, %v539_v39 }
  0x59   : > { %2340 = vmatpush3.bf16.xpose.msra.mxu0 %v432_v9  ;;  %608 = vrot.lane.b32.xlu1 %v2980_v11, %s2809_s0 }
  0x5a   : > { %2531 = vmatprep.subr.msk.bf16.mxu0 %vm400_vm2, %v2960_v6  ;;  %v545_v50 = vpack.c.b8 %v544_v41, %v544_v41  ;;  %v547_v53 = vpack.c.b8 %v546_v42, %v546_v42  ;;  %v549_v55 = vpack.c.b8 %v548_v44, %v548_v44  ;;  %v551_v56 = vpack.c.b8 %v550_v45, %v550_v45 }
  0x5c   : > { %606 = vrot.lane.b32.xlu0 %v2988_v12, %s2809_s0  ;;  %vm3095_vm5 = vnez %v545_v50  ;;  %vm3099_vm6 = vnez %v547_v53  ;;  %vm3107_vm7 = vnez %v549_v55  ;;  %vm3111_vm8 = vnez %v551_v56 }
  0x5d   : > { %604 = vrot.lane.b32.xlu1 %v2992_v13, %s2809_s0  ;;  %v570_v32 = vsel %vm3107_vm7, 16843009, %v2813_v33  ;;  %v571_v34 = vsel %vm3111_vm8, 16843009, %v2813_v33 }
  0x5e   : > { %v578_v45 = vunpack.c.0.s8 %v570_v32 }
  0x60   : > { %715 = vrot.lane.b32.xlu0 %v2950_v3, %s2810_s19  ;;  %vm586_vm15 = vcmp.ne.s32.totalorder %v578_v45, 0 }
  0x61   : > { %2342 = vmatpush3.bf16.xpose.msra.mxu0 %v429_v14  ;;  %713 = vrot.lane.b32.xlu1 %v2953_v4, %s2810_s19 }
  0x62   : > { %2532 = vmatprep.subr.msk.bf16.mxu0 %vm400_vm2, %v2967_v7 }
  0x64   : > { %711 = vrot.lane.b32.xlu0 %v2960_v6, %s2810_s19 }
  0x65   : > { %709 = vrot.lane.b32.xlu1 %v2967_v7, %s2810_s19 }
  0x68   : > { %707 = vrot.lane.b32.xlu0 %v2971_v8, %s2810_s19 }
  0x69   : > { %2344 = vmatpush3.bf16.xpose.msra.mxu0 %v426_v15  ;;  %705 = vrot.lane.b32.xlu1 %v2980_v11, %s2810_s19 }
  0x6a   : > { %2533 = vmatprep.subr.msk.bf16.mxu0 %vm400_vm2, %v2971_v8 }
  0x6c   : > { %703 = vrot.lane.b32.xlu0 %v2988_v12, %s2810_s19 }
  0x6d   : > { %701 = vrot.lane.b32.xlu1 %v2992_v13, %s2810_s19 }
  0x70   : > { %693 = vrot.lane.b32.xlu0 %v2976_v10, %s2810_s19 }
  0x71   : > { %2346 = vmatpush3.bf16.xpose.msra.mxu0 %v423_v16  ;;  %695 = vrot.lane.b32.xlu1 %v3023_v17, %s2810_s19 }
  0x72   : > { %2534 = vmatprep.subr.msk.bf16.mxu0 %vm400_vm2, %v2980_v11 }
  0x74   : > { %697 = vrot.lane.b32.xlu0 %v3030_v18, %s2810_s19 }
  0x75   : > { %699 = vrot.lane.b32.xlu1 %v3035_v19, %s2810_s19 }
  0x78   : > { %876 = vrot.lane.b32.xlu0 %v2950_v3, %s2811_s28 }
  0x79   : > { %2348 = vmatpush3.bf16.xpose.msra.mxu0 %v420_v20  ;;  %874 = vrot.lane.b32.xlu1 %v2953_v4, %s2811_s28  ;;  %v552_v20 = vpack.c.b16 %v540_v57, %v540_v57 }
  0x7a   : > { %2535 = vmatprep.subr.msk.bf16.mxu0 %vm400_vm2, %v2988_v12 }
  0x7b   : > { %v553_v36 = vpack.c.b8 %v552_v20, %v552_v20 }
  0x7c   : > { %872 = vrot.lane.b32.xlu0 %v2960_v6, %s2811_s28 }
  0x7d   : > { %870 = vrot.lane.b32.xlu1 %v2967_v7, %s2811_s28  ;;  %vm564_vm9 = vnez %v553_v36 }
  0x80   : > { %868 = vrot.lane.b32.xlu0 %v2971_v8, %s2811_s28 }
  0x81   : > { %2350 = vmatpush3.bf16.xpose.msra.mxu0 %v417_v21  ;;  %866 = vrot.lane.b32.xlu1 %v2980_v11, %s2811_s28 }
  0x82   : > { %2536 = vmatprep.subr.msk.bf16.mxu0 %vm400_vm2, %v2992_v13 }
  0x84   : > { %864 = vrot.lane.b32.xlu0 %v2988_v12, %s2811_s28 }
  0x85   : > { %862 = vrot.lane.b32.xlu1 %v2992_v13, %s2811_s28 }
  0x88   : > { %973 = vrot.lane.b32.xlu0 %v2950_v3, %s2812_s29 }
  0x89   : > { %2352 = vmatpush3.bf16.xpose.msra.mxu0 %v414_v22  ;;  %971 = vrot.lane.b32.xlu1 %v2953_v4, %s2812_s29 }
  0x8c   : > { %969 = vrot.lane.b32.xlu0 %v2960_v6, %s2812_s29 }
  0x8d   : > { %967 = vrot.lane.b32.xlu1 %v2967_v7, %s2812_s29 }
  0x90   : > { %2354 = vmatmul.mubr.msk.bf16.vlgmr.msra.gmra.mxu0 %vm400_vm2, %v3023_v17  ;;  %965 = vrot.lane.b32.xlu0 %v2971_v8, %s2812_s29 }
  0x91   : > { %2357 = vmatprep.mubr.msk.bf16.mxu0 %vm400_vm2, %v3030_v18  ;;  %963 = vrot.lane.b32.xlu1 %v2980_v11, %s2812_s29 }
  0x94   : > { %961 = vrot.lane.b32.xlu0 %v2988_v12, %s2812_s29 }
  0x95   : > { %959 = vrot.lane.b32.xlu1 %v2992_v13, %s2812_s29 }
  0x98   : > { %2358 = vmatmul.mubr.msk.bf16.gmra.mxu0 %vm400_vm2, %v3035_v19  ;;  %951 = vrot.lane.b32.xlu0 %v2976_v10, %s2812_s29 }
  0x99   : > { %953 = vrot.lane.b32.xlu1 %v3023_v17, %s2812_s29 }
  0x9c   : > { %955 = vrot.lane.b32.xlu0 %v3030_v18, %s2812_s29 }
  0x9d   : > { %957 = vrot.lane.b32.xlu1 %v3035_v19, %s2812_s29 }
  0xa0   : > { %1134 = vrot.lane.b32.xlu0 %v2950_v3, %s2814_s18 }
  0xa1   : > { %1132 = vrot.lane.b32.xlu1 %v2953_v4, %s2814_s18 }
  0xa4   : > { %1130 = vrot.lane.b32.xlu0 %v2960_v6, %s2814_s18 }
  0xa5   : > { %1128 = vrot.lane.b32.xlu1 %v2967_v7, %s2814_s18 }
  0xa8   : > { %1126 = vrot.lane.b32.xlu0 %v2971_v8, %s2814_s18 }
  0xa9   : > { %1124 = vrot.lane.b32.xlu1 %v2980_v11, %s2814_s18 }
  0xac   : > { %1122 = vrot.lane.b32.xlu0 %v2988_v12, %s2814_s18 }
  0xad   : > { %1120 = vrot.lane.b32.xlu1 %v2992_v13, %s2814_s18 }
  0xb0   : > { %1231 = vrot.lane.b32.xlu0 %v2950_v3, %s2815_s30 }
  0xb1   : > { %1229 = vrot.lane.b32.xlu1 %v2953_v4, %s2815_s30 }
  0xb4   : > { %1227 = vrot.lane.b32.xlu0 %v2960_v6, %s2815_s30 }
  0xb5   : > { %1225 = vrot.lane.b32.xlu1 %v2967_v7, %s2815_s30 }
  0xb8   : > { %1223 = vrot.lane.b32.xlu0 %v2971_v8, %s2815_s30 }
  0xb9   : > { %1221 = vrot.lane.b32.xlu1 %v2980_v11, %s2815_s30 }
  0xbc   : > { %1219 = vrot.lane.b32.xlu0 %v2988_v12, %s2815_s30 }
  0xbd   : > { %1217 = vrot.lane.b32.xlu1 %v2992_v13, %s2815_s30 }
  0xc0   : > { %1209 = vrot.lane.b32.xlu0 %v2976_v10, %s2815_s30 }
  0xc1   : > { %1211 = vrot.lane.b32.xlu1 %v3023_v17, %s2815_s30 }
  0xc2   : > { %v619_v23 = vpop.permute.xlu0 %618 }
  0xc3   : > { %2361 = vmatprep.subr.bf16.mxu1 %v619_v23  ;;  %v615_v25 = vpop.permute.xlu1 %614 }
  0xc4   : > { %2362 = vmatpush3.bf16.msra.mxu1 %v619_v23  ;;  %v554_v23 = vpack.c.b16 %v541_v60, %v541_v60  ;;  %1213 = vrot.lane.b32.xlu0 %v3030_v18, %s2815_s30 }
  0xc5   : > { %1215 = vrot.lane.b32.xlu1 %v3035_v19, %s2815_s30 }
  0xc6   : > { %v617_v24 = vpop.permute.xlu0 %616  ;;  %v555_v39 = vpack.c.b8 %v554_v23, %v554_v23 }
  0xc7   : > { %2363 = vmatprep.subr.bf16.mxu1 %v617_v24  ;;  %v613_v26 = vpop.permute.xlu1 %612 }
  0xc8   : > { %2364 = vmatpush3.bf16.msra.mxu1 %v617_v24  ;;  %vm565_vm10 = vnez %v555_v39  ;;  %1392 = vrot.lane.b32.xlu0 %v2950_v3, %s2816_s5 }
  0xc9   : > { %2365 = vmatprep.subr.bf16.mxu1 %v615_v25  ;;  %v573_v50 = vsel %vm565_vm10, 16843009, %v2813_v33  ;;  %1390 = vrot.lane.b32.xlu1 %v2953_v4, %s2816_s5  ;;  %vm1579_vm10 = vcmask 130048  }
  0xca   : > { %v611_v27 = vpop.permute.xlu0 %610  ;;  %v581_v60 = vunpack.c.0.s8 %v573_v50 }
  0xcb   : > { %v609_v28 = vpop.permute.xlu1 %608 }
  0xcc   : > { %2366 = vmatpush3.bf16.msra.mxu1 %v615_v25  ;;  %v556_v25 = vpack.c.b16 %v542_v0, %v542_v0  ;;  %1388 = vrot.lane.b32.xlu0 %v2960_v6, %s2816_s5 }
  0xcd   : > { %2367 = vmatprep.subr.bf16.mxu1 %v613_v26  ;;  %1386 = vrot.lane.b32.xlu1 %v2967_v7, %s2816_s5 }
  0xce   : > { %v607_v29 = vpop.permute.xlu0 %606 }
  0xcf   : > { %v605_v30 = vpop.permute.xlu1 %604 }
  0xd0   : > { %2368 = vmatpush3.bf16.msra.mxu1 %v613_v26  ;;  %v558_v26 = vpack.c.b16 %v543_v1, %v543_v1  ;;  %1384 = vrot.lane.b32.xlu0 %v2971_v8, %s2816_s5 }
  0xd1   : > { %2369 = vmatprep.subr.bf16.mxu1 %v611_v27  ;;  %1382 = vrot.lane.b32.xlu1 %v2980_v11, %s2816_s5 }
  0xd2   : > { %v3057_v31 = vpop.permute.xlu0 %715  ;;  %v559_v41 = vpack.c.b8 %v558_v26, %v558_v26 }
  0xd3   : > { %v714_v1 = vpop.permute.xlu1 %713 }
  0xd4   : > { %2370 = vmatpush3.bf16.msra.mxu1 %v611_v27  ;;  %v568_v27 = vsel %vm3095_vm5, 16843009, %v2813_v33  ;;  %vm567_vm12 = vnez %v559_v41  ;;  %vm589_vm5 = vcmp.ne.s32.totalorder %v581_v60, 0  ;;  %1380 = vrot.lane.b32.xlu0 %v2988_v12, %s2816_s5 }
  0xd5   : > { %2371 = vmatprep.subr.bf16.mxu1 %v609_v28  ;;  %v576_v42 = vunpack.c.0.s8 %v568_v27  ;;  %v575_v53 = vsel %vm567_vm12, 16843009, %v2813_v33  ;;  %1378 = vrot.lane.b32.xlu1 %v2992_v13, %s2816_s5  ;;  %vm1726_vm12 = vcmask 7168  }
  0xd6   : > { %v583_v0 = vunpack.c.0.s8 %v575_v53 }
  0xd7   : > { %vm584_vm13 = vcmp.ne.s32.totalorder %v576_v42, 0 }
  0xd8   : > { %2372 = vmatpush3.bf16.msra.mxu1 %v609_v28  ;;  %vm591_vm7 = vcmp.ne.s32.totalorder %v583_v0, 0 }
  0xd9   : > { %2373 = vmatprep.subr.bf16.mxu1 %v607_v29 }
  0xdc   : > { %2374 = vmatpush3.bf16.msra.mxu1 %v607_v29 }
  0xdd   : > { %2375 = vmatprep.subr.bf16.mxu1 %v605_v30 }
  0xe0   : > { %2376 = vmatpush3.bf16.msra.mxu1 %v605_v30  ;;  %v569_v30 = vsel %vm3099_vm6, 16843009, %v2813_v33 }
  0xe1   : > { %2537 = vmatprep.subr.msk.bf16.mxu1 %vm400_vm2, %v3057_v31 }
 0x150   : > { %v2355_v40 = vpop.f32.mrf.mxu0 }
 0x151   : > { %v2147_v48 = vclamps-f32 %v2355_v40, 5.0  ;;  %v557_v40 = vpack.c.b8 %v556_v25, %v556_v25  ;;  %v710_v25 = vpop.permute.xlu1 %709 }
 0x152   : > { %v471_v43 = vpop.f32.mrf.mxu0  ;;  %v742_v26 = vsel %vm400_vm2, %v710_v25, 0 }
 0x153   : > { %v2145_v46 = vclamps-f32 %v471_v43, 5.0  ;;  %v522_v61 = vmul.f32 1.442695, %v2147_v48  ;;  %v577_v43 = vunpack.c.0.s8 %v569_v30  ;;  %vm566_vm11 = vnez %v557_v40  ;;  %v712_v48 = vpop.permute.xlu0 %711 }
 0x154   : > { %v2356_v49 = vpop.f32.mrf.mxu0 }
 0x155   : > { %v518_v51 = vmul.f32 1.442695, %v2145_v46  ;;  %v2148_v52 = vclamps-f32 %v2356_v49, 5.0  ;;  %v579_v46 = vunpack.c.0.s8 %v571_v34  ;;  %vm585_vm14 = vcmp.ne.s32.totalorder %v577_v43, 0  ;;  %v706_v17 = vpop.permute.xlu1 %705 }
 0x156   : > { %v474_v54 = vpop.f32.mrf.mxu0  ;;  %v572_v49 = vsel %vm564_vm9, 16843009, %v2813_v33  ;;  %vm3143_vm1 = vmpackc.low %vm585_vm14, %vm584_vm13  ;;  %v736_v18 = vsel %vm400_vm2, %v706_v17, 0  ;;  %vm1735_vm13 = vcmask 15360   ;;  %vm1605_vm14 = vcmask 261120  }
 0x157   : > { %v524_v58 = vmul.f32 1.442695, %v2148_v52  ;;  %v2146_v59 = vclamps-f32 %v474_v54, 5.0  ;;  %2649 = vpow2.f32 %v518_v51  ;;  %vm587_vm0 = vcmp.ne.s32.totalorder %v579_v46, 0  ;;  %v708_v62 = vpop.permute.xlu0 %707 }
 0x158   : > { %v2359_v63 = vpop.f32.mrf.mxu0  ;;  %v574_v52 = vsel %vm566_vm11, 16843009, %v2813_v33  ;;  %vm3147_vm3 = vmpackc.low %vm587_vm0, %vm586_vm15  ;;  %v739_v10 = vsel %vm400_vm2, %v708_v62, 0  ;;  %vm1588_vm11 = vcmask 195584   ;;  %vm1744_vm15 = vcmask 23552  }
 0x159   : > { %v520_v2 = vmul.f32 1.442695, %v2146_v59  ;;  %v2151_v9 = vclamps-f32 %v2359_v63, 5.0  ;;  %2651 = vpow2.f32 %v524_v58  ;;  %v580_v59 = vunpack.c.0.s8 %v572_v49  ;;  %v702_v4 = vpop.permute.xlu1 %701 }
 0x15a   : > { %v487_v16 = vpop.f32.mrf.mxu0  ;;  %v582_v63 = vunpack.c.0.s8 %v574_v52  ;;  %v730_v6 = vsel %vm400_vm2, %v702_v4, 0  ;;  %vm1761_vm0 = vcmask 31744  }
 0x15b   : > { %2653 = vpow2.f32 %v520_v2  ;;  %v530_v21 = vmul.f32 1.442695, %v2151_v9  ;;  %v2149_v22 = vclamps-f32 %v487_v16, 5.0  ;;  %vm588_vm4 = vcmp.ne.s32.totalorder %v580_v59, 0  ;;  %v704_v9 = vpop.permute.xlu0 %703 }
 0x15c   : > { %2655 = vpow2.f32 %v522_v61  ;;  %v2360_v24 = vpop.f32.mrf.mxu0  ;;  %v751_v61 = vsel %vm400_vm2, %v3057_v31, 0  ;;  %vm590_vm6 = vcmp.ne.s32.totalorder %v582_v63, 0  ;;  %vm3166_vm8 = vmpackc.low %vm589_vm5, %vm588_vm4  ;;  %v733_v3 = vsel %vm400_vm2, %v704_v9, 0 }
 0x15d   : > { %v526_v28 = vmul.f32 1.442695, %v2149_v22  ;;  %v2152_v29 = vclamps-f32 %v2360_v24, 5.0  ;;  %2657 = vpow2.f32 %v530_v21  ;;  %vm3170_vm9 = vmpackc.low %vm591_vm7, %vm590_vm6  ;;  %v748_v22 = vsel %vm400_vm2, %v714_v1, 0  ;;  %v696_v7 = vpop.permute.xlu1 %695 }
 0x15e   : > { %v490_v35 = vpop.f32.mrf.mxu0  ;;  %v745_v24 = vsel %vm400_vm2, %v712_v48, 0 }
 0x15f   : > { %v532_v37 = vmul.f32 1.442695, %v2152_v29  ;;  %v2150_v38 = vclamps-f32 %v490_v35, 5.0  ;;  %2659 = vpow2.f32 %v526_v28  ;;  %v694_v23 = vpop.permute.xlu0 %693 }
 0x161   : > { %2661 = vpow2.f32 %v532_v37  ;;  %v528_v44 = vmul.f32 1.442695, %v2150_v38  ;;  %v700_v11 = vpop.permute.xlu1 %699 }
 0x163   : > { %2663 = vpow2.f32 %v528_v44  ;;  %v698_v8 = vpop.permute.xlu0 %697 }
 0x164   : > { %v2650_v47 = vpop.eup %2649 }
 0x165   : > { %v875_v13 = vpop.permute.xlu1 %874 }
 0x166   : > { %v2652_v51 = vpop.eup %2651 }
 0x167   : > { %v877_v12 = vpop.permute.xlu0 %876 }
 0x168   : > { %v2654_v54 = vpop.eup %2653  ;;  %2409 = vmatprep.subr.bf16.mxu0 %v877_v12 }
 0x169   : > { %v2656_v56 = vpop.eup %2655  ;;  %v2154_v57 = vpack.c.bf16 %v2654_v54, %v2650_v47  ;;  %2410 = vmatpush3.bf16.msra.mxu0 %v877_v12  ;;  %v871_v27 = vpop.permute.xlu1 %870 }
 0x16a   : > { %v2157_v33 = vpack.c.bf16 %v2652_v51, %v2656_v56  ;;  %v2658_v2 = vpop.eup %2657  ;;  %2411 = vmatprep.subr.bf16.mxu0 %v875_v13 }
 0x16b   : > { %2377 = vmatprep.mubr.msk.bf16.mxu1 %vm3143_vm1, %v2154_v57  ;;  %v873_v19 = vpop.permute.xlu0 %872 }
 0x16c   : > { %2378 = vmatmul.mubr.msk.bf16.vlgmr.msra.gmra.mxu1 %vm3147_vm3, %v2157_v33  ;;  %v2660_v5 = vpop.eup %2659 }
 0x16d   : > { %2386 = vmatpush3.bf16.xpose.msra.mxu1 %v751_v61  ;;  %2412 = vmatpush3.bf16.msra.mxu0 %v875_v13  ;;  %v867_v29 = vpop.permute.xlu1 %866 }
 0x16e   : > { %v2662_v31 = vpop.eup %2661  ;;  %2538 = vmatprep.subr.msk.bf16.mxu1 %vm400_vm2, %v714_v1  ;;  %2413 = vmatprep.subr.bf16.mxu0 %v873_v19 }
 0x16f   : > { %v2163_v16 = vpack.c.bf16 %v2662_v31, %v2658_v2  ;;  %v869_v28 = vpop.permute.xlu0 %868 }
 0x170   : > { %v2664_v14 = vpop.eup %2663 }
 0x171   : > { %v2160_v20 = vpack.c.bf16 %v2664_v14, %v2660_v5  ;;  %2414 = vmatpush3.bf16.msra.mxu0 %v873_v19  ;;  %v863_v32 = vpop.permute.xlu1 %862 }
 0x172   : > { %2415 = vmatprep.subr.bf16.mxu0 %v871_v27 }
 0x173   : > { %2381 = vmatprep.mubr.msk.bf16.mxu1 %vm3166_vm8, %v2160_v20  ;;  %v865_v30 = vpop.permute.xlu0 %864 }
 0x174   : > { %2382 = vmatmul.mubr.msk.bf16.gmra.mxu1 %vm3170_vm9, %v2163_v16 }
 0x175   : > { %2388 = vmatpush3.bf16.xpose.msra.mxu1 %v748_v22  ;;  %2401 = vmatprep.mubr.msk.bf16.mxu1 %vm400_vm2, %v694_v23  ;;  %v3225_v35 = vpop.permute.xlu1 %971 }
 0x176   : > { %2539 = vmatprep.subr.msk.bf16.mxu1 %vm400_vm2, %v712_v48  ;;  %2416 = vmatpush3.bf16.msra.mxu0 %v871_v27 }
 0x177   : > { %2417 = vmatprep.subr.bf16.mxu0 %v869_v28  ;;  %v3223_v34 = vpop.permute.xlu0 %973 }
 0x179   : > { %v3229_v37 = vpop.permute.xlu1 %967 }
 0x17a   : > { %2418 = vmatpush3.bf16.msra.mxu0 %v869_v28 }
 0x17b   : > { %2419 = vmatprep.subr.bf16.mxu0 %v867_v29  ;;  %v3227_v36 = vpop.permute.xlu0 %969 }
 0x17d   : > { %2390 = vmatpush3.bf16.xpose.msra.mxu1 %v745_v24  ;;  %v3233_v39 = vpop.permute.xlu1 %963 }
 0x17e   : > { %2540 = vmatprep.subr.msk.bf16.mxu1 %vm400_vm2, %v710_v25  ;;  %2420 = vmatpush3.bf16.msra.mxu0 %v867_v29 }
 0x17f   : > { %2421 = vmatprep.subr.bf16.mxu0 %v865_v30  ;;  %v3231_v38 = vpop.permute.xlu0 %965 }
 0x181   : > { %v3237_v41 = vpop.permute.xlu1 %959 }
 0x182   : > { %2422 = vmatpush3.bf16.msra.mxu0 %v865_v30  ;;  %v1009_v30 = vsel %vm400_vm2, %v3223_v34, 0 }
 0x183   : > { %2423 = vmatprep.subr.bf16.mxu0 %v863_v32  ;;  %v3235_v40 = vpop.permute.xlu0 %961 }
 0x185   : > { %2392 = vmatpush3.bf16.xpose.msra.mxu1 %v742_v26  ;;  %v3243_v43 = vpop.permute.xlu1 %953 }
 0x186   : > { %2541 = vmatprep.subr.msk.bf16.mxu1 %vm400_vm2, %v708_v62  ;;  %2424 = vmatpush3.bf16.msra.mxu0 %v863_v32 }
 0x187   : > { %2545 = vmatprep.subr.msk.bf16.mxu0 %vm400_vm2, %v3223_v34  ;;  %v3241_v42 = vpop.permute.xlu0 %951  ;;  %v1006_v34 = vsel %vm400_vm2, %v3225_v35, 0 }
 0x189   : > { %v3247_v45 = vpop.permute.xlu1 %957 }
 0x18b   : > { %v3245_v44 = vpop.permute.xlu0 %955 }
 0x18d   : > { %2394 = vmatpush3.bf16.xpose.msra.mxu1 %v739_v10  ;;  %v1133_v47 = vpop.permute.xlu1 %1132 }
 0x18e   : > { %2542 = vmatprep.subr.msk.bf16.mxu1 %vm400_vm2, %v706_v17 }
 0x18f   : > { %v1135_v46 = vpop.permute.xlu0 %1134 }
 0x191   : > { %v1129_v49 = vpop.permute.xlu1 %1128 }
 0x193   : > { %v1131_v48 = vpop.permute.xlu0 %1130 }
 0x195   : > { %2396 = vmatpush3.bf16.xpose.msra.mxu1 %v736_v18  ;;  %v1125_v51 = vpop.permute.xlu1 %1124 }
 0x196   : > { %2543 = vmatprep.subr.msk.bf16.mxu1 %vm400_vm2, %v704_v9 }
 0x197   : > { %v1127_v50 = vpop.permute.xlu0 %1126 }
 0x199   : > { %v1121_v53 = vpop.permute.xlu1 %1120 }
 0x19b   : > { %v1123_v52 = vpop.permute.xlu0 %1122 }
 0x19d   : > { %2398 = vmatpush3.bf16.xpose.msra.mxu1 %v733_v3 }
 0x19e   : > { %2544 = vmatprep.subr.msk.bf16.mxu1 %vm400_vm2, %v702_v4 }
 0x19f   : > { %v3249_v54 = vpop.permute.xlu0 %1231 }
 0x1a5   : > { %2400 = vmatpush3.bf16.xpose.msra.mxu1 %v730_v6 }
 0x1a6   : > { %2457 = vmatprep.subr.bf16.mxu1 %v1135_v46 }
 0x1ac   : > { %2402 = vmatmul.mubr.msk.bf16.vlgmr.msra.gmra.mxu1 %vm400_vm2, %v696_v7 }
 0x1ad   : > { %2405 = vmatprep.mubr.msk.bf16.mxu1 %vm400_vm2, %v698_v8  ;;  %2458 = vmatpush3.bf16.msra.mxu1 %v1135_v46 }
 0x1ae   : > { %2459 = vmatprep.subr.bf16.mxu1 %v1133_v47 }
 0x1b1   : > { %2460 = vmatpush3.bf16.msra.mxu1 %v1133_v47 }
 0x1b2   : > { %2461 = vmatprep.subr.bf16.mxu1 %v1131_v48 }
 0x1b4   : > { %2406 = vmatmul.mubr.msk.bf16.gmra.mxu1 %vm400_vm2, %v700_v11 }
 0x1b5   : > { %2462 = vmatpush3.bf16.msra.mxu1 %v1131_v48 }
 0x1b6   : > { %2463 = vmatprep.subr.bf16.mxu1 %v1129_v49 }
 0x1b9   : > { %2464 = vmatpush3.bf16.msra.mxu1 %v1129_v49 }
 0x1ba   : > { %2465 = vmatprep.subr.bf16.mxu1 %v1127_v50 }
 0x1bd   : > { %2466 = vmatpush3.bf16.msra.mxu1 %v1127_v50 }
 0x1be   : > { %2467 = vmatprep.subr.bf16.mxu1 %v1125_v51 }
 0x1c1   : > { %2468 = vmatpush3.bf16.msra.mxu1 %v1125_v51 }
 0x1c2   : > { %2469 = vmatprep.subr.bf16.mxu1 %v1123_v52 }
 0x1c5   : > { %2470 = vmatpush3.bf16.msra.mxu1 %v1123_v52  ;;  %v1003_v52 = vsel %vm400_vm2, %v3227_v36, 0 }
 0x1c6   : > { %2471 = vmatprep.subr.bf16.mxu1 %v1121_v53 }
 0x1c9   : > { %2472 = vmatpush3.bf16.msra.mxu1 %v1121_v53  ;;  %v3311_v53 = vpop.permute.xlu0 %1227 }
 0x1ca   : > { %2553 = vmatprep.subr.msk.bf16.mxu1 %vm400_vm2, %v3249_v54 }
 0x22c   : > { %v3253_v56 = vpop.f32.mrf.mxu1 }
 0x22d   : > { %1634 = vrot.lane.b32.xlu0 %v3253_v56, %s2810_s19 }
 0x22e   : > { %v3257_v57 = vpop.f32.mrf.mxu1 }
 0x230   : > { %v3259_v59 = vpop.f32.mrf.mxu1 }
 0x231   : > { %1630 = vrot.lane.b32.xlu0 %v3257_v57, %s2810_s19  ;;  %1636 = vrot.lane.b32.xlu1 %v3259_v59, %s2810_s19 }
 0x232   : > { %v3265_v60 = vpop.f32.mrf.mxu1 }
 0x234   : > { %v3267_v33 = vpop.f32.mrf.mxu1 }
 0x235   : > { %1632 = vrot.lane.b32.xlu1 %v3265_v60, %s2810_s19  ;;  %1642 = vrot.lane.b32.xlu0 %v3267_v33, %s2810_s19 }
 0x236   : > { %v3273_v61 = vpop.f32.mrf.mxu1 }
 0x238   : > { %v3275_v62 = vpop.f32.mrf.mxu1 }
 0x239   : > { %1644 = vrot.lane.b32.xlu1 %v3275_v62, %s2810_s19  ;;  %1638 = vrot.lane.b32.xlu0 %v3273_v61, %s2810_s19 }
 0x23a   : > { %v3281_v63 = vpop.f32.mrf.mxu1 }
 0x23d   : > { %1640 = vrot.lane.b32.xlu1 %v3281_v63, %s2810_s19 }
 0x26c   : > { %v2403_v0 = vpop.f32.mrf.mxu1 }
 0x26d   : > { %v2171_v5 = vclamps-f32 %v2403_v0, 5.0  ;;  %v997_v0 = vsel %vm400_vm2, %v3231_v38, 0 }
 0x26e   : > { %v787_v1 = vpop.f32.mrf.mxu1 }
 0x26f   : > { %v2169_v2 = vclamps-f32 %v787_v1, 5.0  ;;  %v838_v23 = vmul.f32 1.442695, %v2171_v5  ;;  %v3317_v1 = vpop.permute.xlu0 %1223 }
 0x270   : > { %v2404_v31 = vpop.f32.mrf.mxu1 }
 0x271   : > { %v834_v9 = vmul.f32 1.442695, %v2169_v2  ;;  %v2172_v14 = vclamps-f32 %v2404_v31, 5.0  ;;  %v991_v31 = vsel %vm400_vm2, %v3235_v40, 0 }
 0x272   : > { %v790_v16 = vpop.f32.mrf.mxu1 }
 0x273   : > { %v840_v20 = vmul.f32 1.442695, %v2172_v14  ;;  %v2170_v22 = vclamps-f32 %v790_v16, 5.0  ;;  %2665 = vpow2.f32 %v834_v9  ;;  %v3325_v2 = vpop.permute.xlu0 %1219  ;;  %v988_v16 = vsel %vm400_vm2, %v3237_v41, 0 }
 0x274   : > { %v2407_v24 = vpop.f32.mrf.mxu1 }
 0x275   : > { %v836_v25 = vmul.f32 1.442695, %v2170_v22  ;;  %v2175_v26 = vclamps-f32 %v2407_v24, 5.0  ;;  %2667 = vpow2.f32 %v840_v20 }
 0x276   : > { %v803_v10 = vpop.f32.mrf.mxu1 }
 0x277   : > { %2669 = vpow2.f32 %v836_v25  ;;  %v846_v17 = vmul.f32 1.442695, %v2175_v26  ;;  %v2173_v18 = vclamps-f32 %v803_v10, 5.0 }
 0x278   : > { %2671 = vpow2.f32 %v838_v23  ;;  %v2408_v3 = vpop.f32.mrf.mxu1 }
 0x279   : > { %v842_v4 = vmul.f32 1.442695, %v2173_v18  ;;  %v2176_v6 = vclamps-f32 %v2408_v3, 5.0  ;;  %2673 = vpow2.f32 %v846_v17 }
 0x27a   : > { %v806_v7 = vpop.f32.mrf.mxu1 }
 0x27b   : > { %v848_v8 = vmul.f32 1.442695, %v2176_v6  ;;  %v2174_v11 = vclamps-f32 %v806_v7, 5.0  ;;  %2675 = vpow2.f32 %v842_v4 }
 0x27d   : > { %2677 = vpow2.f32 %v848_v8  ;;  %v844_v12 = vmul.f32 1.442695, %v2174_v11 }
 0x27f   : > { %2679 = vpow2.f32 %v844_v12 }
 0x280   : > { %v2666_v13 = vpop.eup %2665 }
 0x282   : > { %v2668_v19 = vpop.eup %2667 }
 0x284   : > { %v2670_v27 = vpop.eup %2669 }
 0x285   : > { %v2672_v28 = vpop.eup %2671  ;;  %v2178_v29 = vpack.c.bf16 %v2670_v27, %v2666_v13 }
 0x286   : > { %v2181_v32 = vpack.c.bf16 %v2668_v19, %v2672_v28  ;;  %v2674_v46 = vpop.eup %2673 }
 0x287   : > { %2425 = vmatprep.mubr.msk.bf16.mxu0 %vm3143_vm1, %v2178_v29 }
 0x288   : > { %2426 = vmatmul.mubr.msk.bf16.vlgmr.msra.gmra.mxu0 %vm3147_vm3, %v2181_v32  ;;  %v2676_v47 = vpop.eup %2675 }
 0x289   : > { %2434 = vmatpush3.bf16.xpose.msra.mxu0 %v1009_v30 }
 0x28a   : > { %v2678_v48 = vpop.eup %2677  ;;  %2546 = vmatprep.subr.msk.bf16.mxu0 %vm400_vm2, %v3225_v35  ;;  %v1000_v35 = vsel %vm400_vm2, %v3229_v37, 0 }
 0x28b   : > { %v2187_v50 = vpack.c.bf16 %v2678_v48, %v2674_v46 }
 0x28c   : > { %v2680_v49 = vpop.eup %2679 }
 0x28d   : > { %v2184_v51 = vpack.c.bf16 %v2680_v49, %v2676_v47 }
 0x28f   : > { %2429 = vmatprep.mubr.msk.bf16.mxu0 %vm3166_vm8, %v2184_v51 }
 0x290   : > { %2430 = vmatmul.mubr.msk.bf16.gmra.mxu0 %vm3170_vm9, %v2187_v50 }
 0x291   : > { %2436 = vmatpush3.bf16.xpose.msra.mxu0 %v1006_v34  ;;  %2449 = vmatprep.mubr.msk.bf16.mxu0 %vm400_vm2, %v3241_v42  ;;  %v3313_v42 = vpop.permute.xlu1 %1229 }
 0x292   : > { %2547 = vmatprep.subr.msk.bf16.mxu0 %vm400_vm2, %v3227_v36 }
 0x295   : > { %v3321_v36 = vpop.permute.xlu1 %1225 }
 0x299   : > { %2438 = vmatpush3.bf16.xpose.msra.mxu0 %v1003_v52  ;;  %v3327_v5 = vpop.permute.xlu1 %1221 }
 0x29a   : > { %2548 = vmatprep.subr.msk.bf16.mxu0 %vm400_vm2, %v3229_v37  ;;  %v994_v37 = vsel %vm400_vm2, %v3233_v39, 0 }
 0x29d   : > { %v3335_v9 = vpop.permute.xlu1 %1217 }
 0x2a1   : > { %2440 = vmatpush3.bf16.xpose.msra.mxu0 %v1000_v35  ;;  %v3341_v14 = vpop.permute.xlu1 %1211 }
 0x2a2   : > { %2549 = vmatprep.subr.msk.bf16.mxu0 %vm400_vm2, %v3231_v38  ;;  %v3331_v38 = vpop.permute.xlu0 %1209 }
 0x2a5   : > { %v3345_v22 = vpop.permute.xlu1 %1215 }
 0x2a9   : > { %2442 = vmatpush3.bf16.xpose.msra.mxu0 %v997_v0 }
 0x2aa   : > { %2550 = vmatprep.subr.msk.bf16.mxu0 %vm400_vm2, %v3233_v39  ;;  %v3339_v39 = vpop.permute.xlu0 %1213 }
 0x2ae   : > { %v1393_v20 = vpop.permute.xlu0 %1392 }
 0x2b1   : > { %2444 = vmatpush3.bf16.xpose.msra.mxu0 %v994_v37 }
 0x2b2   : > { %2551 = vmatprep.subr.msk.bf16.mxu0 %vm400_vm2, %v3235_v40  ;;  %v1391_v40 = vpop.permute.xlu1 %1390  ;;  %v1389_v23 = vpop.permute.xlu0 %1388 }
 0x2b6   : > { %v1385_v24 = vpop.permute.xlu0 %1384 }
 0x2b9   : > { %2446 = vmatpush3.bf16.xpose.msra.mxu0 %v991_v31 }
 0x2ba   : > { %2552 = vmatprep.subr.msk.bf16.mxu0 %vm400_vm2, %v3237_v41  ;;  %v1387_v41 = vpop.permute.xlu1 %1386 }
 0x2be   : > { %v1383_v25 = vpop.permute.xlu1 %1382 }
 0x2c1   : > { %2448 = vmatpush3.bf16.xpose.msra.mxu0 %v988_v16 }
 0x2c2   : > { %2505 = vmatprep.subr.bf16.mxu0 %v1393_v20 }
 0x2c8   : > { %2450 = vmatmul.mubr.msk.bf16.vlgmr.msra.gmra.mxu0 %vm400_vm2, %v3243_v43  ;;  %v1381_v43 = vpop.permute.xlu0 %1380 }
 0x2c9   : > { %2453 = vmatprep.mubr.msk.bf16.mxu0 %vm400_vm2, %v3245_v44  ;;  %2506 = vmatpush3.bf16.msra.mxu0 %v1393_v20  ;;  %v1379_v44 = vpop.permute.xlu1 %1378 }
 0x2ca   : > { %2507 = vmatprep.subr.bf16.mxu0 %v1391_v40 }
 0x2cd   : > { %2508 = vmatpush3.bf16.msra.mxu0 %v1391_v40 }
 0x2ce   : > { %2509 = vmatprep.subr.bf16.mxu0 %v1389_v23 }
 0x2d0   : > { %2454 = vmatmul.mubr.msk.bf16.gmra.mxu0 %vm400_vm2, %v3247_v45 }
 0x2d1   : > { %2510 = vmatpush3.bf16.msra.mxu0 %v1389_v23 }
 0x2d2   : > { %2511 = vmatprep.subr.bf16.mxu0 %v1387_v41 }
 0x2d5   : > { %2512 = vmatpush3.bf16.msra.mxu0 %v1387_v41 }
 0x2d6   : > { %2513 = vmatprep.subr.bf16.mxu0 %v1385_v24 }
 0x2d9   : > { %2514 = vmatpush3.bf16.msra.mxu0 %v1385_v24 }
 0x2da   : > { %2515 = vmatprep.subr.bf16.mxu0 %v1383_v25 }
 0x2dd   : > { %2516 = vmatpush3.bf16.msra.mxu0 %v1383_v25  ;;  %v1267_v25 = vsel %vm400_vm2, %v3249_v54, 0  ;;  %v1264_v54 = vsel %vm400_vm2, %v3313_v42, 0 }
 0x2de   : > { %2517 = vmatprep.subr.bf16.mxu0 %v1381_v43 }
 0x2e1   : > { %2518 = vmatpush3.bf16.msra.mxu0 %v1381_v43 }
 0x2e2   : > { %2519 = vmatprep.subr.bf16.mxu0 %v1379_v44 }
 0x2e5   : > { %2520 = vmatpush3.bf16.msra.mxu0 %v1379_v44 }
 0x348   : > { %v2427_v26 = vpop.f32.mrf.mxu0 }
 0x349   : > { %1487 = vrot.lane.b32.xlu0 %v2427_v26, %s2817_s7 }
 0x34a   : > { %v920_v45 = vpop.f32.mrf.mxu0 }
 0x34c   : > { %v2428_v10 = vpop.f32.mrf.mxu0 }
 0x34d   : > { %1658 = vrot.lane.b32.xlu0 %v2427_v26, %s2818_s8  ;;  %1489 = vrot.lane.b32.xlu1 %v2428_v10, %s2817_s7 }
 0x34e   : > { %v923_v17 = vpop.f32.mrf.mxu0 }
 0x350   : > { %v2431_v18 = vpop.f32.mrf.mxu0 }
 0x351   : > { %1483 = vrot.lane.b32.xlu0 %v920_v45, %s2817_s7  ;;  %1660 = vrot.lane.b32.xlu1 %v2428_v10, %s2818_s8 }
 0x352   : > { %v936_v3 = vpop.f32.mrf.mxu0 }
 0x354   : > { %v2432_v4 = vpop.f32.mrf.mxu0 }
 0x355   : > { %1654 = vrot.lane.b32.xlu0 %v920_v45, %s2818_s8  ;;  %1485 = vrot.lane.b32.xlu1 %v923_v17, %s2817_s7 }
 0x356   : > { %v939_v6 = vpop.f32.mrf.mxu0 }
 0x359   : > { %1656 = vrot.lane.b32.xlu1 %v923_v17, %s2818_s8  ;;  %1495 = vrot.lane.b32.xlu0 %v2431_v18, %s2817_s7 }
 0x35d   : > { %1666 = vrot.lane.b32.xlu0 %v2431_v18, %s2818_s8  ;;  %1497 = vrot.lane.b32.xlu1 %v2432_v4, %s2817_s7 }
 0x361   : > { %1491 = vrot.lane.b32.xlu0 %v936_v3, %s2817_s7  ;;  %1668 = vrot.lane.b32.xlu1 %v2432_v4, %s2818_s8 }
 0x365   : > { %1662 = vrot.lane.b32.xlu0 %v936_v3, %s2818_s8  ;;  %1493 = vrot.lane.b32.xlu1 %v939_v6, %s2817_s7  ;;  %v1261_v3 = vsel %vm400_vm2, %v3311_v53, 0 }
 0x369   : > { %1664 = vrot.lane.b32.xlu1 %v939_v6, %s2818_s8 }
 0x388   : > { %v2451_v7 = vpop.f32.mrf.mxu0 }
 0x389   : > { %v2195_v12 = vclamps-f32 %v2451_v7, 5.0 }
 0x38a   : > { %v1045_v8 = vpop.f32.mrf.mxu0 }
 0x38b   : > { %v2193_v11 = vclamps-f32 %v1045_v8, 5.0  ;;  %v1096_v32 = vmul.f32 1.442695, %v2195_v12 }
 0x38c   : > { %v2452_v13 = vpop.f32.mrf.mxu0 }
 0x38d   : > { %v1092_v19 = vmul.f32 1.442695, %v2193_v11  ;;  %v2196_v27 = vclamps-f32 %v2452_v13, 5.0 }
 0x38e   : > { %v1048_v28 = vpop.f32.mrf.mxu0 }
 0x38f   : > { %v1098_v29 = vmul.f32 1.442695, %v2196_v27  ;;  %v2194_v30 = vclamps-f32 %v1048_v28, 5.0  ;;  %2681 = vpow2.f32 %v1092_v19 }
 0x390   : > { %v2455_v46 = vpop.f32.mrf.mxu0 }
 0x391   : > { %v1094_v47 = vmul.f32 1.442695, %v2194_v30  ;;  %v2199_v48 = vclamps-f32 %v2455_v46, 5.0  ;;  %2683 = vpow2.f32 %v1098_v29 }
 0x392   : > { %v1061_v49 = vpop.f32.mrf.mxu0 }
 0x393   : > { %2685 = vpow2.f32 %v1094_v47  ;;  %v1104_v50 = vmul.f32 1.442695, %v2199_v48  ;;  %v2197_v51 = vclamps-f32 %v1061_v49, 5.0 }
 0x394   : > { %2687 = vpow2.f32 %v1096_v32  ;;  %v2456_v34 = vpop.f32.mrf.mxu0 }
 0x395   : > { %v1100_v52 = vmul.f32 1.442695, %v2197_v51  ;;  %v2200_v35 = vclamps-f32 %v2456_v34, 5.0  ;;  %2689 = vpow2.f32 %v1104_v50 }
 0x396   : > { %v1064_v0 = vpop.f32.mrf.mxu0 }
 0x397   : > { %v1106_v37 = vmul.f32 1.442695, %v2200_v35  ;;  %v2198_v31 = vclamps-f32 %v1064_v0, 5.0  ;;  %2691 = vpow2.f32 %v1100_v52 }
 0x399   : > { %2693 = vpow2.f32 %v1106_v37  ;;  %v1102_v16 = vmul.f32 1.442695, %v2198_v31 }
 0x39b   : > { %2695 = vpow2.f32 %v1102_v16 }
 0x39c   : > { %v2682_v20 = vpop.eup %2681 }
 0x39e   : > { %v2684_v40 = vpop.eup %2683 }
 0x3a0   : > { %v2686_v23 = vpop.eup %2685 }
 0x3a1   : > { %v2688_v41 = vpop.eup %2687  ;;  %v2202_v24 = vpack.c.bf16 %v2686_v23, %v2682_v20 }
 0x3a2   : > { %v2205_v43 = vpack.c.bf16 %v2684_v40, %v2688_v41  ;;  %v2690_v44 = vpop.eup %2689 }
 0x3a3   : > { %2473 = vmatprep.mubr.msk.bf16.mxu1 %vm3143_vm1, %v2202_v24 }
 0x3a4   : > { %2474 = vmatmul.mubr.msk.bf16.vlgmr.msra.gmra.mxu1 %vm3147_vm3, %v2205_v43  ;;  %v2692_v26 = vpop.eup %2691 }
 0x3a5   : > { %2482 = vmatpush3.bf16.xpose.msra.mxu1 %v1267_v25 }
 0x3a6   : > { %v2694_v45 = vpop.eup %2693  ;;  %2554 = vmatprep.subr.msk.bf16.mxu1 %vm400_vm2, %v3313_v42  ;;  %v1258_v42 = vsel %vm400_vm2, %v3321_v36, 0 }
 0x3a7   : > { %v2211_v17 = vpack.c.bf16 %v2694_v45, %v2690_v44 }
 0x3a8   : > { %v2696_v10 = vpop.eup %2695 }
 0x3a9   : > { %v2208_v18 = vpack.c.bf16 %v2696_v10, %v2692_v26 }
 0x3ab   : > { %2477 = vmatprep.mubr.msk.bf16.mxu1 %vm3166_vm8, %v2208_v18 }
 0x3ac   : > { %2478 = vmatmul.mubr.msk.bf16.gmra.mxu1 %vm3170_vm9, %v2211_v17 }
 0x3ad   : > { %2484 = vmatpush3.bf16.xpose.msra.mxu1 %v1264_v54  ;;  %2497 = vmatprep.mubr.msk.bf16.mxu1 %vm400_vm2, %v3331_v38  ;;  %v1255_v38 = vsel %vm400_vm2, %v3317_v1, 0  ;;  %v3408_v54 = vpop.permute.xlu0 %1634 }
 0x3ae   : > { %2555 = vmatprep.subr.msk.bf16.mxu1 %vm400_vm2, %v3311_v53  ;;  %v1252_v53 = vsel %vm400_vm2, %v3327_v5, 0 }
 0x3b5   : > { %2486 = vmatpush3.bf16.xpose.msra.mxu1 %v1261_v3  ;;  %v3412_v3 = vpop.permute.xlu1 %1636 }
 0x3b6   : > { %2556 = vmatprep.subr.msk.bf16.mxu1 %vm400_vm2, %v3321_v36  ;;  %v1249_v36 = vsel %vm400_vm2, %v3325_v2, 0 }
 0x3bd   : > { %2488 = vmatpush3.bf16.xpose.msra.mxu1 %v1258_v42  ;;  %v3414_v42 = vpop.permute.xlu0 %1630 }
 0x3be   : > { %2557 = vmatprep.subr.msk.bf16.mxu1 %vm400_vm2, %v3317_v1  ;;  %v1246_v1 = vsel %vm400_vm2, %v3335_v9, 0 }
 0x3c5   : > { %2490 = vmatpush3.bf16.xpose.msra.mxu1 %v1255_v38  ;;  %v3418_v38 = vpop.permute.xlu1 %1632 }
 0x3c6   : > { %2558 = vmatprep.subr.msk.bf16.mxu1 %vm400_vm2, %v3327_v5 }
 0x3cd   : > { %2492 = vmatpush3.bf16.xpose.msra.mxu1 %v1252_v53  ;;  %v3420_v53 = vpop.permute.xlu0 %1642 }
 0x3ce   : > { %2559 = vmatprep.subr.msk.bf16.mxu1 %vm400_vm2, %v3325_v2 }
 0x3d5   : > { %2494 = vmatpush3.bf16.xpose.msra.mxu1 %v1249_v36 }
 0x3d6   : > { %2560 = vmatprep.subr.msk.bf16.mxu1 %vm400_vm2, %v3335_v9 }
 0x3dd   : > { %2496 = vmatpush3.bf16.xpose.msra.mxu1 %v1246_v1  ;;  %v3424_v1 = vpop.permute.xlu1 %1644 }
 0x3e4   : > { %2498 = vmatmul.mubr.msk.bf16.vlgmr.msra.gmra.mxu1 %vm400_vm2, %v3341_v14 }
 0x3e5   : > { %2501 = vmatprep.mubr.msk.bf16.mxu1 %vm400_vm2, %v3339_v39 }
 0x3ec   : > { %2502 = vmatmul.mubr.msk.bf16.gmra.mxu1 %vm400_vm2, %v3345_v22 }
 0x464   : > { %v2475_v5 = vpop.f32.mrf.mxu1 }
 0x465   : > { %1519 = vrot.lane.b32.xlu0 %v2475_v5, %s2819_s9 }
 0x466   : > { %v1178_v2 = vpop.f32.mrf.mxu1 }
 0x468   : > { %v2476_v4 = vpop.f32.mrf.mxu1 }
 0x469   : > { %1682 = vrot.lane.b32.xlu0 %v2475_v5, %s2820_s20  ;;  %1521 = vrot.lane.b32.xlu1 %v2476_v4, %s2819_s9  ;;  %v3428_v5 = vpop.permute.xlu0 %1638 }
 0x46a   : > { %v1181_v6 = vpop.f32.mrf.mxu1 }
 0x46c   : > { %v2479_v9 = vpop.f32.mrf.mxu1 }
 0x46d   : > { %1515 = vrot.lane.b32.xlu0 %v1178_v2, %s2819_s9  ;;  %1684 = vrot.lane.b32.xlu1 %v2476_v4, %s2820_s20  ;;  %v3432_v4 = vpop.permute.xlu1 %1640 }
 0x46e   : > { %v1194_v14 = vpop.f32.mrf.mxu1 }
 0x470   : > { %v2480_v39 = vpop.f32.mrf.mxu1 }
 0x471   : > { %1678 = vrot.lane.b32.xlu0 %v1178_v2, %s2820_s20  ;;  %1517 = vrot.lane.b32.xlu1 %v1181_v6, %s2819_s9 }
 0x472   : > { %v1197_v22 = vpop.f32.mrf.mxu1 }
 0x475   : > { %1680 = vrot.lane.b32.xlu1 %v1181_v6, %s2820_s20  ;;  %1527 = vrot.lane.b32.xlu0 %v2479_v9, %s2819_s9  ;;  %v1488_v6 = vpop.permute.xlu0 %1487 }
 0x479   : > { %1690 = vrot.lane.b32.xlu0 %v2479_v9, %s2820_s20  ;;  %1529 = vrot.lane.b32.xlu1 %v2480_v39, %s2819_s9 }
 0x47d   : > { %1523 = vrot.lane.b32.xlu0 %v1194_v14, %s2819_s9  ;;  %1692 = vrot.lane.b32.xlu1 %v2480_v39, %s2820_s20  ;;  %v1659_v39 = vpop.permute.xlu0 %1658 }
 0x481   : > { %1686 = vrot.lane.b32.xlu0 %v1194_v14, %s2820_s20  ;;  %1525 = vrot.lane.b32.xlu1 %v1197_v22, %s2819_s9  ;;  %v1490_v14 = vpop.permute.xlu1 %1489 }
 0x485   : > { %1688 = vrot.lane.b32.xlu1 %v1197_v22, %s2820_s20  ;;  %v1661_v22 = vpop.permute.xlu1 %1660 }
 0x4a4   : > { %v2499_v7 = vpop.f32.mrf.mxu1 }
 0x4a5   : > { %v2219_v12 = vclamps-f32 %v2499_v7, 5.0  ;;  %v1484_v7 = vpop.permute.xlu0 %1483 }
 0x4a6   : > { %v1303_v8 = vpop.f32.mrf.mxu1 }
 0x4a7   : > { %v2217_v11 = vclamps-f32 %v1303_v8, 5.0  ;;  %v1354_v32 = vmul.f32 1.442695, %v2219_v12  ;;  %v3439_v8 = vpop.permute.xlu1 %1485 }
 0x4a8   : > { %v2500_v13 = vpop.f32.mrf.mxu1 }
 0x4a9   : > { %v1350_v19 = vmul.f32 1.442695, %v2217_v11  ;;  %v2220_v27 = vclamps-f32 %v2500_v13, 5.0  ;;  %v3441_v11 = vpop.permute.xlu0 %1654 }
 0x4aa   : > { %v1306_v28 = vpop.f32.mrf.mxu1 }
 0x4ab   : > { %v1356_v29 = vmul.f32 1.442695, %v2220_v27  ;;  %v2218_v30 = vclamps-f32 %v1306_v28, 5.0  ;;  %2697 = vpow2.f32 %v1350_v19  ;;  %v3443_v12 = vpop.permute.xlu1 %1656 }
 0x4ac   : > { %v2503_v46 = vpop.f32.mrf.mxu1 }
 0x4ad   : > { %v1352_v47 = vmul.f32 1.442695, %v2218_v30  ;;  %v2223_v48 = vclamps-f32 %v2503_v46, 5.0  ;;  %2699 = vpow2.f32 %v1356_v29  ;;  %v3445_v13 = vpop.permute.xlu0 %1495 }
 0x4ae   : > { %v1319_v49 = vpop.f32.mrf.mxu1 }
 0x4af   : > { %2701 = vpow2.f32 %v1352_v47  ;;  %v1362_v50 = vmul.f32 1.442695, %v2223_v48  ;;  %v2221_v51 = vclamps-f32 %v1319_v49, 5.0  ;;  %v3447_v19 = vpop.permute.xlu1 %1497 }
 0x4b0   : > { %2703 = vpow2.f32 %v1354_v32  ;;  %v2504_v34 = vpop.f32.mrf.mxu1 }
 0x4b1   : > { %v1358_v52 = vmul.f32 1.442695, %v2221_v51  ;;  %v2224_v35 = vclamps-f32 %v2504_v34, 5.0  ;;  %2705 = vpow2.f32 %v1362_v50  ;;  %v3449_v27 = vpop.permute.xlu0 %1666 }
 0x4b2   : > { %v1322_v0 = vpop.f32.mrf.mxu1 }
 0x4b3   : > { %v1364_v37 = vmul.f32 1.442695, %v2224_v35  ;;  %v2222_v31 = vclamps-f32 %v1322_v0, 5.0  ;;  %2707 = vpow2.f32 %v1358_v52  ;;  %v3451_v28 = vpop.permute.xlu1 %1668 }
 0x4b5   : > { %2709 = vpow2.f32 %v1364_v37  ;;  %v1360_v16 = vmul.f32 1.442695, %v2222_v31  ;;  %v3453_v29 = vpop.permute.xlu0 %1491 }
 0x4b7   : > { %2711 = vpow2.f32 %v1360_v16  ;;  %v3455_v30 = vpop.permute.xlu1 %1493 }
 0x4b8   : > { %v2698_v20 = vpop.eup %2697 }
 0x4b9   : > { %v3457_v32 = vpop.permute.xlu0 %1662 }
 0x4ba   : > { %v2700_v40 = vpop.eup %2699 }
 0x4bb   : > { %v3459_v46 = vpop.permute.xlu1 %1664 }
 0x4bc   : > { %v2702_v23 = vpop.eup %2701 }
 0x4bd   : > { %v2704_v41 = vpop.eup %2703  ;;  %v2226_v24 = vpack.c.bf16 %v2702_v23, %v2698_v20 }
 0x4be   : > { %v2229_v25 = vpack.c.bf16 %v2700_v40, %v2704_v41  ;;  %v2706_v43 = vpop.eup %2705  ;;  %v1573_v41 = vsel %vm400_vm2, %v3253_v56, %v1488_v6  ;;  %v1616_v56 = vld [vmem:[#allocation3 + $0x10] sm:$0xff] }
 0x4bf   : > { %2521 = vmatprep.mubr.msk.bf16.mxu0 %vm3143_vm1, %v2226_v24  ;;  %v1469_v24 = vld [vmem:[#allocation2 + $0x10] sm:$0xff] }
 0x4c0   : > { %2522 = vmatmul.mubr.msk.bf16.vlgmr.msra.gmra.mxu0 %vm3147_vm3, %v2229_v25  ;;  %v2708_v44 = vpop.eup %2707 }
 0x4c2   : > { %v2710_v26 = vpop.eup %2709 }
 0x4c3   : > { %v2235_v10 = vpack.c.bf16 %v2710_v26, %v2706_v43 }
 0x4c4   : > { %v2712_v45 = vpop.eup %2711 }
 0x4c5   : > { %v2232_v17 = vpack.c.bf16 %v2712_v45, %v2708_v44 }
 0x4c7   : > { %2525 = vmatprep.mubr.msk.bf16.mxu0 %vm3166_vm8, %v2232_v17  ;;  %v1574_v17 = vsel %vm400_vm2, %v3259_v59, %v1490_v14  ;;  %v1571_v59 = vsel %vm400_vm2, %v3257_v57, %v1484_v7  ;;  %v1467_v14 = vld [vmem:[#allocation2] sm:$0xff] }
 0x4c8   : > { %2526 = vmatmul.mubr.msk.bf16.gmra.mxu0 %vm3170_vm9, %v2235_v10  ;;  %v1729_v10 = vsel %vm1726_vm12, %v3408_v54, %v1659_v39  ;;  %v1617_v39 = vld [vmem:[#allocation3 + $0x18] sm:$0xff] }
 0x4d7   : > { %v1520_v47 = vpop.permute.xlu0 %1519 }
 0x4d8   : > { %v1582_v25 = vsel %vm1579_vm10, %v1573_v41, %v1520_v47 }
 0x4db   : > { %v1522_v48 = vpop.permute.xlu1 %1521  ;;  %v1683_v49 = vpop.permute.xlu0 %1682 }
 0x4df   : > { %v1685_v50 = vpop.permute.xlu1 %1684  ;;  %v1516_v51 = vpop.permute.xlu0 %1515 }
 0x4e0   : > { %v1580_v47 = vsel %vm1579_vm10, %v1571_v59, %v1516_v51  ;;  %v1468_v51 = vld [vmem:[#allocation2 + $0x8] sm:$0xff] }
 0x4e3   : > { %v1518_v34 = vpop.permute.xlu1 %1517  ;;  %v1679_v52 = vpop.permute.xlu0 %1678 }
 0x4e7   : > { %v3461_v35 = vpop.permute.xlu1 %1680  ;;  %v3463_v0 = vpop.permute.xlu0 %1527 }
 0x4eb   : > { %v3465_v37 = vpop.permute.xlu1 %1529  ;;  %v3467_v31 = vpop.permute.xlu0 %1690 }
 0x4ef   : > { %v3469_v16 = vpop.permute.xlu1 %1692  ;;  %v3471_v20 = vpop.permute.xlu0 %1523 }
 0x4f3   : > { %v3473_v40 = vpop.permute.xlu1 %1525  ;;  %v3475_v23 = vpop.permute.xlu0 %1686 }
 0x4f7   : > { %v3480_v43 = vpop.permute.xlu1 %1688 }
 0x580   : > { %v2523_v18 = vpop.f32.mrf.mxu0 }
 0x581   : > { %1551 = vrot.lane.b32.xlu0 %v2523_v18, %s2821_s11 }
 0x582   : > { %v1436_v55 = vpop.f32.mrf.mxu0 }
 0x584   : > { %v2524_v58 = vpop.f32.mrf.mxu0 }
 0x585   : > { %1706 = vrot.lane.b32.xlu0 %v2523_v18, %s2822_s12  ;;  %1553 = vrot.lane.b32.xlu1 %v2524_v58, %s2821_s11  ;;  %v1470_v18 = vld [vmem:[#allocation2 + $0x18] sm:$0xff] }
 0x586   : > { %v1439_v15 = vpop.f32.mrf.mxu0 }
 0x588   : > { %v2527_v21 = vpop.f32.mrf.mxu0 }
 0x589   : > { %1547 = vrot.lane.b32.xlu0 %v1436_v55, %s2821_s11  ;;  %1708 = vrot.lane.b32.xlu1 %v2524_v58, %s2822_s12  ;;  %v1583_v58 = vsel %vm1579_vm10, %v1574_v17, %v1522_v48 }
 0x58a   : > { %v1452_v36 = vpop.f32.mrf.mxu0 }
 0x58c   : > { %v2528_v2 = vpop.f32.mrf.mxu0 }
 0x58d   : > { %1702 = vrot.lane.b32.xlu0 %v1436_v55, %s2822_s12  ;;  %1549 = vrot.lane.b32.xlu1 %v1439_v15, %s2821_s11  ;;  %v1738_v55 = vsel %vm1735_vm13, %v1729_v10, %v1683_v49 }
 0x58e   : > { %v1455_v9 = vpop.f32.mrf.mxu0 }
 0x591   : > { %1704 = vrot.lane.b32.xlu1 %v1439_v15, %s2822_s12  ;;  %1559 = vrot.lane.b32.xlu0 %v2527_v21, %s2821_s11 }
 0x595   : > { %1555 = vrot.lane.b32.xlu0 %v1452_v36, %s2821_s11  ;;  %1561 = vrot.lane.b32.xlu1 %v2528_v2, %s2821_s11 }
 0x599   : > { %1710 = vrot.lane.b32.xlu0 %v1452_v36, %s2822_s12  ;;  %1557 = vrot.lane.b32.xlu1 %v1455_v9, %s2821_s11 }
 0x59d   : > { %1714 = vrot.lane.b32.xlu0 %v2527_v21, %s2822_s12  ;;  %1712 = vrot.lane.b32.xlu1 %v1455_v9, %s2822_s12  ;;  %v1730_v9 = vsel %vm1726_vm12, %v3412_v3, %v1661_v22  ;;  %v1727_v3 = vsel %vm1726_vm12, %v3414_v42, %v3441_v11  ;;  %v1572_v22 = vsel %vm400_vm2, %v3265_v60, %v3439_v8 }
 0x59e   : > { %v1739_v48 = vsel %vm1735_vm13, %v1730_v9, %v1685_v50  ;;  %v1614_v50 = vld [vmem:[#allocation3] sm:$0xff]  ;;  %v1728_v60 = vsel %vm1726_vm12, %v3418_v38, %v3443_v12  ;;  %v1577_v8 = vsel %vm400_vm2, %v3267_v33, %v3445_v13  ;;  %v1578_v13 = vsel %vm400_vm2, %v3275_v62, %v3447_v19 }
 0x5a1   : > { %1716 = vrot.lane.b32.xlu1 %v2528_v2, %s2822_s12 }
 0x5f3   : > { %v1552_v44 = vpop.permute.xlu0 %1551 }
 0x5f4   : > { %v1591_v26 = vsel %vm1588_vm11, %v1582_v25, %v1552_v44  ;;  %v1736_v44 = vsel %vm1735_vm13, %v1727_v3, %v1679_v52  ;;  %v1473_v52 = vld [vmem:[#allocation2 + $0x30] sm:$0xff] }
 0x5f5   : > { %v1599_v45 = vadd.f32 %v1591_v26, %v1469_v24  ;;  %v1581_v26 = vsel %vm1579_vm10, %v1572_v22, %v1518_v34  ;;  %v1615_v34 = vld [vmem:[#allocation3 + $0x8] sm:$0xff] }
 0x5f7   : > { %1608 = vst.msk [vmem:[#allocation2 + $0x10] sm:$0xff] %vm1605_vm14, %v1599_v45  ;;  %v1707_v15 = vpop.permute.xlu0 %1706  ;;  %v1554_v21 = vpop.permute.xlu1 %1553 }
 0x5f8   : > { %v1747_v36 = vsel %vm1744_vm15, %v1738_v55, %v1707_v15  ;;  %v1592_v2 = vsel %vm1588_vm11, %v1583_v58, %v1554_v21  ;;  %v1586_v55 = vsel %vm1579_vm10, %v1577_v8, %v3463_v0  ;;  %v1471_v0 = vld [vmem:[#allocation2 + $0x20] sm:$0xff] }
 0x5f9   : > { %v1755_v6 = vadd.f32 %v1747_v36, %v1616_v56  ;;  %v1600_v54 = vadd.f32 %v1592_v2, %v1470_v18  ;;  %v1737_v18 = vsel %vm1735_vm13, %v1728_v60, %v3461_v35  ;;  %v1575_v35 = vsel %vm400_vm2, %v3273_v61, %v3453_v29  ;;  %v1474_v36 = vld [vmem:[#allocation2 + $0x38] sm:$0xff] }
 0x5fa   : > { %v1587_v2 = vsel %vm1579_vm10, %v1578_v13, %v3465_v37  ;;  %v1731_v29 = vsel %vm1726_vm12, %v3428_v5, %v3457_v32  ;;  %v1576_v37 = vsel %vm400_vm2, %v3281_v63, %v3455_v30  ;;  %v1733_v30 = vsel %vm1726_vm12, %v3420_v53, %v3449_v27 }
 0x5fb   : > { %1764 = vst.msk [vmem:[#allocation3 + $0x10] sm:$0xff] %vm1761_vm0, %v1755_v6  ;;  %v1548_v49 = vpop.permute.xlu0 %1547  ;;  %v1709_v41 = vpop.permute.xlu1 %1708  ;;  %v1584_v6 = vsel %vm1579_vm10, %v1575_v35, %v3471_v20  ;;  %v1618_v20 = vld [vmem:[#allocation3 + $0x20] sm:$0xff] }
 0x5fc   : > { %1609 = vst.msk [vmem:[#allocation2 + $0x18] sm:$0xff] %vm1605_vm14, %v1600_v54  ;;  %v1589_v24 = vsel %vm1588_vm11, %v1580_v47, %v1548_v49  ;;  %v1748_v25 = vsel %vm1744_vm15, %v1739_v48, %v1709_v41  ;;  %v1585_v47 = vsel %vm1579_vm10, %v1576_v37, %v3473_v40  ;;  %v1732_v40 = vsel %vm1726_vm12, %v3432_v4, %v3459_v46 }
 0x5fd   : > { %v1597_v57 = vadd.f32 %v1589_v24, %v1467_v14  ;;  %v1756_v7 = vadd.f32 %v1748_v25, %v1617_v39  ;;  %v1472_v14 = vld [vmem:[#allocation2 + $0x28] sm:$0xff]  ;;  %v1740_v39 = vsel %vm1735_vm13, %v1731_v29, %v3475_v23  ;;  %v1620_v23 = vld [vmem:[#allocation3 + $0x30] sm:$0xff]  ;;  %v1742_v25 = vsel %vm1735_vm13, %v1733_v30, %v3467_v31  ;;  %v1621_v31 = vld [vmem:[#allocation3 + $0x38] sm:$0xff] }
 0x5fe   : > { %v1619_v24 = vld [vmem:[#allocation3 + $0x28] sm:$0xff]  ;;  %v1734_v46 = vsel %vm1726_vm12, %v3424_v1, %v3451_v28 }
 0x5ff   : > { %1606 = vst.msk [vmem:[#allocation2] sm:$0xff] %vm1605_vm14, %v1597_v57  ;;  %v1703_v45 = vpop.permute.xlu0 %1702  ;;  %v1550_v10 = vpop.permute.xlu1 %1549  ;;  %v1741_v57 = vsel %vm1735_vm13, %v1732_v40, %v3480_v43  ;;  %v1743_v43 = vsel %vm1735_vm13, %v1734_v46, %v3469_v16 }
 0x600   : > { %1765 = vst.msk [vmem:[#allocation3 + $0x18] sm:$0xff] %vm1761_vm0, %v1756_v7  ;;  %v1745_v17 = vsel %vm1744_vm15, %v1736_v44, %v1703_v45  ;;  %v1590_v42 = vsel %vm1588_vm11, %v1581_v26, %v1550_v10 }
 0x601   : > { %v1753_v11 = vadd.f32 %v1745_v17, %v1614_v50  ;;  %v1598_v56 = vadd.f32 %v1590_v42, %v1468_v51 }
 0x603   : > { %1762 = vst.msk [vmem:[#allocation3] sm:$0xff] %vm1761_vm0, %v1753_v11  ;;  %v1705_v58 = vpop.permute.xlu1 %1704  ;;  %v1560_v15 = vpop.permute.xlu0 %1559 }
 0x604   : > { %1607 = vst.msk [vmem:[#allocation2 + $0x8] sm:$0xff] %vm1605_vm14, %v1598_v56  ;;  %v1746_v38 = vsel %vm1744_vm15, %v1737_v18, %v1705_v58  ;;  %v1595_v12 = vsel %vm1588_vm11, %v1586_v55, %v1560_v15 }
 0x605   : > { %v1754_v21 = vadd.f32 %v1746_v38, %v1615_v34  ;;  %v1603_v33 = vadd.f32 %v1595_v12, %v1473_v52 }
 0x607   : > { %1763 = vst.msk [vmem:[#allocation3 + $0x8] sm:$0xff] %vm1761_vm0, %v1754_v21  ;;  %v1556_v54 = vpop.permute.xlu0 %1555  ;;  %v1562_v59 = vpop.permute.xlu1 %1561 }
 0x608   : > { %1612 = vst.msk [vmem:[#allocation2 + $0x30] sm:$0xff] %vm1605_vm14, %v1603_v33  ;;  %v1593_v62 = vsel %vm1588_vm11, %v1584_v6, %v1556_v54  ;;  %v1596_v19 = vsel %vm1588_vm11, %v1587_v2, %v1562_v59 }
 0x609   : > { %v1601_v9 = vadd.f32 %v1593_v62, %v1471_v0  ;;  %v1604_v61 = vadd.f32 %v1596_v19, %v1474_v36 }
 0x60b   : > { %1610 = vst.msk [vmem:[#allocation2 + $0x20] sm:$0xff] %vm1605_vm14, %v1601_v9  ;;  %1613 = vst.msk [vmem:[#allocation2 + $0x38] sm:$0xff] %vm1605_vm14, %v1604_v61  ;;  %v1711_v48 = vpop.permute.xlu0 %1710  ;;  %v1558_v49 = vpop.permute.xlu1 %1557 }
 0x60c   : > { %v1749_v5 = vsel %vm1744_vm15, %v1740_v39, %v1711_v48  ;;  %v1594_v32 = vsel %vm1588_vm11, %v1585_v47, %v1558_v49 }
 0x60d   : > { %v1757_v41 = vadd.f32 %v1749_v5, %v1618_v20  ;;  %v1602_v63 = vadd.f32 %v1594_v32, %v1472_v14 }
 0x60f   : > { %1766 = vst.msk [vmem:[#allocation3 + $0x20] sm:$0xff] %vm1761_vm0, %v1757_v41  ;;  %v1715_v7 = vpop.permute.xlu0 %1714  ;;  %v1713_v3 = vpop.permute.xlu1 %1712 }
 0x610   : > { %1611 = vst.msk [vmem:[#allocation2 + $0x28] sm:$0xff] %vm1605_vm14, %v1602_v63  ;;  %v1751_v53 = vsel %vm1744_vm15, %v1742_v25, %v1715_v7  ;;  %v1750_v27 = vsel %vm1744_vm15, %v1741_v57, %v1713_v3 }
 0x611   : > { %v1759_v22 = vadd.f32 %v1751_v53, %v1620_v23  ;;  %v1758_v4 = vadd.f32 %v1750_v27, %v1619_v24 }
 0x613   : > { %1768 = vst.msk [vmem:[#allocation3 + $0x30] sm:$0xff] %vm1761_vm0, %v1759_v22  ;;  %1767 = vst.msk [vmem:[#allocation3 + $0x28] sm:$0xff] %vm1761_vm0, %v1758_v4  ;;  %v1717_v50 = vpop.permute.xlu1 %1716 }
 0x614   : > { %v1752_v51 = vsel %vm1744_vm15, %v1743_v43, %v1717_v50 }
 0x615   : > { %v1760_v44 = vadd.f32 %v1752_v51, %v1621_v31 }
 0x617   : > { %1769 = vst.msk [vmem:[#allocation3 + $0x38] sm:$0xff] %vm1761_vm0, %v1760_v44 }
 0x618 PF: > { %p2237_p5 = scmp.ne.s32.totalorder %s2789_s22, 1 }
 0x61a   : > { %1773 = sbr.rel (%p2237_p5) target bundleno = 1779 (0x6f3), region = 82 }
 0x61f   : > { %v1784_v26 = vld [vmem:[#allocation3 + $0x10] sm:$0xff]  ;;  %v1782_v1 = vld [vmem:[#allocation3] sm:$0xff]  ;;  %v1785_v28 = vld [vmem:[#allocation3 + $0x18] sm:$0xff]  ;;  %v2823_v45 = vmov 0   ;;  %v2824_v36 = vmov 1   ;;  %v2825_v2 = vmov 2  }
 0x620   : > { %2714 = vset.pattern.permute.xlu1 %v2823_v45  ;;  %2713 = vset.pattern.permute.xlu0 %v2823_v45  ;;  %v1792_v16 = vmax.f32 %v1784_v26, 1e-30  ;;  %v1790_v10 = vmax.f32 %v1782_v1, 1e-30  ;;  %v1793_v17 = vmax.f32 %v1785_v28, 1e-30 }
 0x621   : > { %v1783_v42 = vld [vmem:[#allocation3 + $0x8] sm:$0xff]  ;;  %v1786_v60 = vld [vmem:[#allocation3 + $0x20] sm:$0xff]  ;;  %v1789_v52 = vld [vmem:[#allocation3 + $0x38] sm:$0xff]  ;;  %v2826_v6 = vmov 3   ;;  %vm1974_vm2 = vcmask 64512   ;;  %vm1983_vm1 = vcmask 130048  }
 0x622   : > { %v1787_v11 = vld [vmem:[#allocation3 + $0x28] sm:$0xff]  ;;  %2721 = vrcp.f32 %v1792_v16  ;;  %v1791_v56 = vmax.f32 %v1783_v42, 1e-30  ;;  %v1794_v34 = vmax.f32 %v1786_v60, 1e-30  ;;  %v1788_v18 = vld [vmem:[#allocation3 + $0x30] sm:$0xff] }
 0x623   : > { %2723 = vrcp.f32 %v1790_v10  ;;  %v1795_v8 = vmax.f32 %v1787_v11, 1e-30  ;;  %v1797_v55 = vmax.f32 %v1789_v52, 1e-30  ;;  %v1796_v58 = vmax.f32 %v1788_v18, 1e-30 }
 0x624   : > { %2725 = vrcp.f32 %v1793_v17  ;;  %v1774_v25 = vld [vmem:[#allocation2] sm:$0xff]  ;;  %v1777_v27 = vld [vmem:[#allocation2 + $0x18] sm:$0xff]  ;;  %vm1992_vm3 = vcmask 195584   ;;  %vm2001_vm4 = vcmask 261120   ;;  %v1775_v26 = vld [vmem:[#allocation2 + $0x8] sm:$0xff] }
 0x625   : > { %2727 = vrcp.f32 %v1791_v56  ;;  %v1779_v1 = vld [vmem:[#allocation2 + $0x28] sm:$0xff]  ;;  %v1776_v52 = vld [vmem:[#allocation2 + $0x10] sm:$0xff] }
 0x626   : > { %2729 = vrcp.f32 %v1795_v8 }
 0x627   : > { %2731 = vrcp.f32 %v1794_v34 }
 0x628   : > { %2733 = vrcp.f32 %v1797_v55 }
 0x629   : > { %2735 = vrcp.f32 %v1796_v58  ;;  %v1781_v58 = vld [vmem:[#allocation2 + $0x38] sm:$0xff] }
 0x62f   : > { %v2722_v15 = vpop.eup %2721 }
 0x630   : > { %v2724_v38 = vpop.eup %2723  ;;  %1818 = vperm.xlu1 %2714, %v2722_v15  }
 0x631   : > { %v2726_v12 = vpop.eup %2725  ;;  %1808 = vperm.xlu0 %2713, %v2724_v38  }
 0x632   : > { %v2728_v21 = vpop.eup %2727 }
 0x633   : > { %v2730_v33 = vpop.eup %2729 }
 0x634   : > { %1823 = vperm.xlu1 %2714, %v2726_v12   ;;  %v2732_v13 = vpop.eup %2731 }
 0x635   : > { %1813 = vperm.xlu0 %2713, %v2728_v21   ;;  %v2734_v35 = vpop.eup %2733 }
 0x636   : > { %v2736_v0 = vpop.eup %2735 }
 0x638   : > { %1833 = vperm.xlu1 %2714, %v2730_v33  }
 0x639   : > { %1828 = vperm.xlu0 %2713, %v2732_v13  }
 0x63c   : > { %1843 = vperm.xlu1 %2714, %v2734_v35  }
 0x63d   : > { %1838 = vperm.xlu0 %2713, %v2736_v0  }
 0x640   : > { %2716 = vset.pattern.permute.xlu1 %v2824_v36 }
 0x641   : > { %2715 = vset.pattern.permute.xlu0 %v2824_v36  ;;  %1859 = vperm.xlu1 %2716, %v2728_v21  }
 0x642   : > { %1855 = vperm.xlu0 %2715, %v2724_v38  }
 0x645   : > { %1863 = vperm.xlu1 %2716, %v2722_v15  }
 0x646   : > { %1867 = vperm.xlu0 %2715, %v2726_v12  }
 0x649   : > { %1871 = vperm.xlu1 %2716, %v2732_v13  }
 0x64a   : > { %1875 = vperm.xlu0 %2715, %v2730_v33  }
 0x64d   : > { %1879 = vperm.xlu1 %2716, %v2736_v0  }
 0x64e   : > { %1883 = vperm.xlu0 %2715, %v2734_v35  }
 0x651   : > { %2717 = vset.pattern.permute.xlu1 %v2825_v2 }
 0x652   : > { %2718 = vset.pattern.permute.xlu0 %v2825_v2  ;;  %1895 = vperm.xlu1 %2717, %v2724_v38  }
 0x653   : > { %1899 = vperm.xlu0 %2718, %v2728_v21  }
 0x656   : > { %1903 = vperm.xlu1 %2717, %v2722_v15  }
 0x657   : > { %1911 = vperm.xlu0 %2718, %v2732_v13  }
 0x65a   : > { %1907 = vperm.xlu1 %2717, %v2726_v12  }
 0x65b   : > { %1919 = vperm.xlu0 %2718, %v2736_v0  }
 0x65e   : > { %1915 = vperm.xlu1 %2717, %v2730_v33  }
 0x65f   : > { %2719 = vset.pattern.permute.xlu0 %v2826_v6 }
 0x660   : > { %1935 = vperm.xlu0 %2719, %v2724_v38  }
 0x662   : > { %1923 = vperm.xlu1 %2717, %v2734_v35  }
 0x664   : > { %1947 = vperm.xlu0 %2719, %v2726_v12  }
 0x666   : > { %2720 = vset.pattern.permute.xlu1 %v2826_v6 }
 0x667   : > { %1939 = vperm.xlu1 %2720, %v2728_v21  }
 0x668   : > { %1955 = vperm.xlu0 %2719, %v2730_v33  }
 0x66b   : > { %1943 = vperm.xlu1 %2720, %v2722_v15  }
 0x66c   : > { %1963 = vperm.xlu0 %2719, %v2734_v35  }
 0x66f   : > { %1951 = vperm.xlu1 %2720, %v2732_v13  }
 0x673   : > { %1959 = vperm.xlu1 %2720, %v2736_v0  }
 0x6ab   : > { %v3580_v54 = vpop.permute.xlu1 %1818 }
 0x6ac   : > { %v1809_v59 = vpop.permute.xlu0 %1808  ;;  %v1848_v2 = vmul.f32 %v3580_v54, %v1776_v52 }
 0x6ad   : > { %v1846_v53 = vmul.f32 %v1809_v59, %v1774_v25 }
 0x6af   : > { %v1824_v62 = vpop.permute.xlu1 %1823 }
 0x6b0   : > { %v1814_v19 = vpop.permute.xlu0 %1813  ;;  %v1849_v44 = vmul.f32 %v1824_v62, %v1777_v27 }
 0x6b1   : > { %v1847_v56 = vmul.f32 %v1814_v19, %v1775_v26  ;;  %v1778_v19 = vld [vmem:[#allocation2 + $0x20] sm:$0xff] }
 0x6b3   : > { %v1834_v9 = vpop.permute.xlu1 %1833 }
 0x6b4   : > { %v3582_v61 = vpop.permute.xlu0 %1828  ;;  %v1851_v60 = vmul.f32 %v1834_v9, %v1779_v1 }
 0x6b7   : > { %v3584_v29 = vpop.permute.xlu1 %1843 }
 0x6b8   : > { %v3586_v37 = vpop.permute.xlu0 %1838  ;;  %v1853_v9 = vmul.f32 %v3584_v29, %v1781_v58 }
 0x6bc   : > { %v1860_v20 = vpop.permute.xlu1 %1859 }
 0x6bd   : > { %v1856_v14 = vpop.permute.xlu0 %1855  ;;  %v1887_v45 = vmul.f32 %v1860_v20, %v1775_v26 }
 0x6be   : > { %v1886_v57 = vmul.f32 %v1856_v14, %v1774_v25 }
 0x6bf   : > { %v1976_v15 = vsel %vm1974_vm2, %v1847_v56, %v1887_v45 }
 0x6c0   : > { %v1864_v39 = vpop.permute.xlu1 %1863  ;;  %v1975_v4 = vsel %vm1974_vm2, %v1846_v53, %v1886_v57 }
 0x6c1   : > { %v1868_v47 = vpop.permute.xlu0 %1867  ;;  %v1888_v38 = vmul.f32 %v1864_v39, %v1776_v52 }
 0x6c2   : > { %v1889_v46 = vmul.f32 %v1868_v47, %v1777_v27 }
 0x6c3   : > { %v1977_v39 = vsel %vm1974_vm2, %v1848_v2, %v1888_v38 }
 0x6c4   : > { %v3588_v48 = vpop.permute.xlu1 %1871  ;;  %v1978_v17 = vsel %vm1974_vm2, %v1849_v44, %v1889_v46 }
 0x6c5   : > { %v1876_v49 = vpop.permute.xlu0 %1875  ;;  %v1890_v47 = vmul.f32 %v3588_v48, %v1778_v19  ;;  %v1780_v48 = vld [vmem:[#allocation2 + $0x30] sm:$0xff] }
 0x6c6   : > { %v1891_v16 = vmul.f32 %v1876_v49, %v1779_v1 }
 0x6c8   : > { %v3590_v5 = vpop.permute.xlu1 %1879  ;;  %v1980_v12 = vsel %vm1974_vm2, %v1851_v60, %v1891_v16 }
 0x6c9   : > { %v1884_v32 = vpop.permute.xlu0 %1883  ;;  %v1892_v53 = vmul.f32 %v3590_v5, %v1780_v48 }
 0x6ca   : > { %v1893_v13 = vmul.f32 %v1884_v32, %v1781_v58 }
 0x6cc   : > { %v1982_v32 = vsel %vm1974_vm2, %v1853_v9, %v1893_v13 }
 0x6cd   : > { %v1896_v41 = vpop.permute.xlu1 %1895 }
 0x6ce   : > { %v1900_v63 = vpop.permute.xlu0 %1899  ;;  %v1926_v7 = vmul.f32 %v1896_v41, %v1774_v25 }
 0x6cf   : > { %v1927_v42 = vmul.f32 %v1900_v63, %v1775_v26 }
 0x6d0   : > { %v1984_v43 = vsel %vm1983_vm1, %v1975_v4, %v1926_v7 }
 0x6d1   : > { %v1904_v30 = vpop.permute.xlu1 %1903  ;;  %v1985_v35 = vsel %vm1983_vm1, %v1976_v15, %v1927_v42 }
 0x6d2   : > { %v3592_v40 = vpop.permute.xlu0 %1911  ;;  %v1928_v0 = vmul.f32 %v1904_v30, %v1776_v52  ;;  %v1850_v30 = vmul.f32 %v3582_v61, %v1778_v19 }
 0x6d3   : > { %v1930_v29 = vmul.f32 %v3592_v40, %v1778_v19 }
 0x6d4   : > { %v1986_v41 = vsel %vm1983_vm1, %v1977_v39, %v1928_v0 }
 0x6d5   : > { %v1908_v23 = vpop.permute.xlu1 %1907 }
 0x6d6   : > { %v3594_v24 = vpop.permute.xlu0 %1919  ;;  %v1929_v50 = vmul.f32 %v1908_v23, %v1777_v27 }
 0x6d8   : > { %v1987_v8 = vsel %vm1983_vm1, %v1978_v17, %v1929_v50 }
 0x6d9   : > { %v1916_v3 = vpop.permute.xlu1 %1915 }
 0x6da   : > { %v1931_v34 = vmul.f32 %v1916_v3, %v1779_v1  ;;  %v1979_v3 = vsel %vm1974_vm2, %v1850_v30, %v1890_v47 }
 0x6db   : > { %v1936_v22 = vpop.permute.xlu0 %1935  ;;  %v1988_v61 = vsel %vm1983_vm1, %v1979_v3, %v1930_v29 }
 0x6dc   : > { %v1966_v31 = vmul.f32 %v1936_v22, %v1774_v25  ;;  %v1989_v6 = vsel %vm1983_vm1, %v1980_v12, %v1931_v34  ;;  %v1852_v22 = vmul.f32 %v3586_v37, %v1780_v48 }
 0x6dd   : > { %v1924_v51 = vpop.permute.xlu1 %1923 }
 0x6de   : > { %v1993_v28 = vsel %vm1992_vm3, %v1984_v43, %v1966_v31  ;;  %v1933_v59 = vmul.f32 %v1924_v51, %v1781_v58  ;;  %v1981_v31 = vsel %vm1974_vm2, %v1852_v22, %v1892_v53 }
 0x6df   : > { %2002 = vst.msk [vmem:[%s2930_s10] sm:$0xff] %vm2001_vm4, %v1993_v28  ;;  %v1948_v10 = vpop.permute.xlu0 %1947 }
 0x6e0   : > { %v1969_v11 = vmul.f32 %v1948_v10, %v1777_v27  ;;  %v1991_v23 = vsel %vm1983_vm1, %v1982_v32, %v1933_v59  ;;  %v1932_v27 = vmul.f32 %v3594_v24, %v1780_v48 }
 0x6e2   : > { %v1996_v18 = vsel %vm1992_vm3, %v1987_v8, %v1969_v11  ;;  %v1940_v55 = vpop.permute.xlu1 %1939  ;;  %v1990_v50 = vsel %vm1983_vm1, %v1981_v31, %v1932_v27 }
 0x6e3   : > { %2005 = vst.msk [vmem:[%s2930_s10 + $0x18] sm:$0xff] %vm2001_vm4, %v1996_v18  ;;  %v1967_v21 = vmul.f32 %v1940_v55, %v1775_v26  ;;  %v1956_v33 = vpop.permute.xlu0 %1955 }
 0x6e4   : > { %v1971_v36 = vmul.f32 %v1956_v33, %v1779_v1 }
 0x6e5   : > { %v1994_v62 = vsel %vm1992_vm3, %v1985_v35, %v1967_v21 }
 0x6e6   : > { %2003 = vst.msk [vmem:[%s2930_s10 + $0x8] sm:$0xff] %vm2001_vm4, %v1994_v62  ;;  %v1998_v20 = vsel %vm1992_vm3, %v1989_v6, %v1971_v36  ;;  %v1944_v14 = vpop.permute.xlu1 %1943 }
 0x6e7   : > { %2007 = vst.msk [vmem:[%s2930_s10 + $0x28] sm:$0xff] %vm2001_vm4, %v1998_v20  ;;  %v1968_v54 = vmul.f32 %v1944_v14, %v1776_v52  ;;  %v1964_v49 = vpop.permute.xlu0 %1963 }
 0x6e8   : > { %v1973_v63 = vmul.f32 %v1964_v49, %v1781_v58 }
 0x6e9   : > { %v1995_v25 = vsel %vm1992_vm3, %v1986_v41, %v1968_v54 }
 0x6ea   : > { %2004 = vst.msk [vmem:[%s2930_s10 + $0x10] sm:$0xff] %vm2001_vm4, %v1995_v25  ;;  %v2000_v57 = vsel %vm1992_vm3, %v1991_v23, %v1973_v63  ;;  %v1952_v7 = vpop.permute.xlu1 %1951 }
 0x6eb   : > { %2009 = vst.msk [vmem:[%s2930_s10 + $0x38] sm:$0xff] %vm2001_vm4, %v2000_v57  ;;  %v1970_v40 = vmul.f32 %v1952_v7, %v1778_v19 }
 0x6ed   : > { %v1997_v4 = vsel %vm1992_vm3, %v1988_v61, %v1970_v40 }
 0x6ee   : > { %2006 = vst.msk [vmem:[%s2930_s10 + $0x20] sm:$0xff] %vm2001_vm4, %v1997_v4  ;;  %v1960_v46 = vpop.permute.xlu1 %1959 }
 0x6ef   : > { %v1972_v43 = vmul.f32 %v1960_v46, %v1780_v48 }
 0x6f1   : > { %v1999_v5 = vsel %vm1992_vm3, %v1990_v50, %v1972_v43 }
 0x6f2   : > { %2008 = vst.msk [vmem:[%s2930_s10 + $0x30] sm:$0xff] %vm2001_vm4, %v1999_v5 }
 0x6f3 PF: > { %s20_s25 = sadd.s32 1, %s2805_s25   ;;  %s3686_s20 = smov %s2785_s21 }
 0x6f4   : > { %p17_p6 = scmp.ge.s32.totalorder %s20_s25, 10   ;;  %s3687_s21 = smov %s2906_s6 }
 0x6f5   : > { %s3688_s22 = smov %s2797_s23  ;;  %s3689_s0 = smov %s2801_s24 }
 0x6f6   : > { %s3690_s23 = smov %s3693_s26  ;;  %s3691_s24 = smov %s3697_s27 }
 0x6f7   :  { %19 = sbr.rel (!%p17_p6) target bundleno = 19 (0x13), region = 123 }

</bundles_post_ra>
